<compile_context>
chip_gen: v7x
topology: tpu7x:2x2x1
jax: 0.10.0
libtpu: 0.0.40
codegen_flags: <defaults>
</compile_context>

<pallas_src>
from collections import deque

import numpy as np
import jax
import jax.numpy as jnp
from jax.experimental import pallas as pl
from jax.experimental.pallas import tpu as pltpu

MAX_NB = 8
HIDDEN = 32
VOCAB = 16


# ----------------------------------------------------------------------------
# Fused Pallas kernel: grid axis = BFS level; msg / root stay VMEM-resident.
# ----------------------------------------------------------------------------
def _jtnn_kernel(wid_ref, nb_ref, out_ref, awid_ref, anb_ref,
                 emb_ref, wg_ref, bg_ref, ur_ref, whh_ref, wa_ref, wab_ref,
                 msg_ref, root_ref):
    H = HIDDEN
    NB = MAX_NB
    t = pl.program_id(0)
    M = msg_ref.shape[0]          # padded message rows (num_edges + 2, rounded up)
    Ep = wid_ref.shape[0]         # padded edges per level
    R = nb_ref.shape[0]           # Ep * MAX_NB
    V = emb_ref.shape[0]

    @pl.when(t == 0)
    def _():
        msg_ref[...] = jnp.zeros_like(msg_ref)
        root_ref[...] = jnp.zeros_like(root_ref)

    msg = msg_ref[...]                                        # (M, H), zeros at t==0

    # ---- embedding gather via one-hot matmul (VOCAB is tiny) ----------------
    wid = wid_ref[...]                                        # (Ep, 1) int32
    oh_x = jnp.where(
        jax.lax.broadcasted_iota(jnp.int32, (Ep, V), 1) == wid, 1.0, 0.0)
    x = jnp.dot(oh_x, emb_ref[...], preferred_element_type=jnp.float32)   # (Ep, H)

    # ---- neighbor-message gather via one-hot matmul --------------------------
    nb = nb_ref[...]                                          # (R, 1) int32
    oh_nb = jnp.where(
        jax.lax.broadcasted_iota(jnp.int32, (R, M), 1) == nb, 1.0, 0.0)
    hflat = jnp.dot(oh_nb, msg, preferred_element_type=jnp.float32)       # (R, H)
    hnei = hflat.reshape(Ep, NB, H)
    sum_h = jnp.sum(hnei, axis=1)                             # (Ep, H)

    # ---- fused x-side / sum_h-side matmul: [x | sum_h] (Ep, 2H) @ Wg (2H, 4H)
    # cols [0:H]   = x@Wz_x + sum_h@Wz_h
    # cols [H:2H]  = x@Wr_w
    # cols [2H:3H] = x@Wh_x
    xs = jnp.concatenate([x, sum_h], axis=-1)                 # (Ep, 2H)
    g = jnp.dot(xs, wg_ref[...], preferred_element_type=jnp.float32)      # (Ep, 4H)
    bg = bg_ref[...]                                          # (1, 4H) = [bz|bur|bh|0]
    bz, bur, bh = bg[:, 0:H], bg[:, H:2 * H], bg[:, 2 * H:3 * H]

    z = jax.nn.sigmoid(g[:, 0:H] + bz)
    r2 = jnp.dot(hflat, ur_ref[...], preferred_element_type=jnp.float32) + bur
    r = jax.nn.sigmoid(g[:, H:2 * H].reshape(Ep, 1, H) + r2.reshape(Ep, NB, H))
    sum_g = jnp.sum(r * hnei, axis=1)
    pre_h = jnp.tanh(
        g[:, 2 * H:3 * H]
        + jnp.dot(sum_g, whh_ref[...], preferred_element_type=jnp.float32)
        + bh)
    new_h = (1.0 - z) * sum_h + z * pre_h                     # (Ep, H)

    # ---- in-kernel scatter via one-hot matmul --------------------------------
    # Each real edge is written exactly once across the whole grid (onto a zero
    # row), so accumulation == assignment.  Padded rows target the trash row,
    # which is never read.
    out_idx = out_ref[...]                                    # (1, Ep) int32
    scat = jnp.where(
        jax.lax.broadcasted_iota(jnp.int32, (M, Ep), 0) == out_idx, 1.0, 0.0)
    msg_ref[...] = msg + jnp.dot(scat, new_h, preferred_element_type=jnp.float32)

    # ---- root aggregation fused into the last level ---------------------------
    @pl.when(t == pl.num_programs(0) - 1)
    def _():
        msg_final = msg_ref[...]                              # updated buffer
        Na = awid_ref.shape[0]
        Ra = anb_ref.shape[0]
        awid = awid_ref[...]                                  # (Na, 1)
        oh_ax = jnp.where(
            jax.lax.broadcasted_iota(jnp.int32, (Na, V), 1) == awid, 1.0, 0.0)
        xa = jnp.dot(oh_ax, emb_ref[...], preferred_element_type=jnp.float32)
        anb = anb_ref[...]                                    # (Ra, 1)
        oh_anb = jnp.where(
            jax.lax.broadcasted_iota(jnp.int32, (Ra, M), 1) == anb, 1.0, 0.0)
        ha = jnp.dot(oh_anb, msg_final,
                     preferred_element_type=jnp.float32).reshape(Na, NB, H)
        sum_ha = jnp.sum(ha, axis=1)
        xsa = jnp.concatenate([xa, sum_ha], axis=-1)          # (Na, 2H)
        out = (jnp.dot(xsa, wa_ref[...], preferred_element_type=jnp.float32)
               + wab_ref[...])
        root_ref[...] = jnp.maximum(out, 0.0)                 # ReLU


def jtnn_fused_pallas(wid_tab, nb_tab, out_tab, awid_tab, anb_tab, pp, msg_rows):
    """One pallas_call for the whole message-passing forward."""
    T, Ep, _ = wid_tab.shape
    R = nb_tab.shape[1]
    Naggp = awid_tab.shape[0]

    def const_spec(shape):
        nd = len(shape)
        return pl.BlockSpec(shape, lambda t, _n=nd: (0,) * _n)

    weight_args = (pp["embedding"], pp["Wg"], pp["bg"], pp["Ur_w"], pp["Wh_h"],
                   pp["Wa"], pp["Wa_b"])

    in_specs = [
        pl.BlockSpec((None, Ep, 1), lambda t: (t, 0, 0)),       # wid per level
        pl.BlockSpec((None, R, 1), lambda t: (t, 0, 0)),        # nb per level
        pl.BlockSpec((None, 1, Ep), lambda t: (t, 0, 0)),       # out idx per level
        const_spec(awid_tab.shape),
        const_spec(anb_tab.shape),
    ] + [const_spec(w.shape) for w in weight_args]

    out_specs = (const_spec((msg_rows, HIDDEN)),
                 const_spec((Naggp, HIDDEN)))

    msg, root = pl.pallas_call(
        _jtnn_kernel,
        out_shape=(jax.ShapeDtypeStruct((msg_rows, HIDDEN), jnp.float32),
                   jax.ShapeDtypeStruct((Naggp, HIDDEN), jnp.float32)),
        grid=(T,),
        in_specs=in_specs,
        out_specs=out_specs,
        compiler_params=pltpu.CompilerParams(
            dimension_semantics=("arbitrary",)),   # levels are sequential
    )(wid_tab, nb_tab, out_tab, awid_tab, anb_tab, *weight_args)
    return msg, root


# ----------------------------------------------------------------------------
# Pure-JAX references (for correctness check)
# ----------------------------------------------------------------------------
def gru_ref(x, h_nei, p):
    sum_h = jnp.sum(h_nei, axis=1)
    z = jax.nn.sigmoid(x @ p["Wz_x"] + sum_h @ p["Wz_h"] + p["Wz_b"])
    r1 = (x @ p["Wr_w"])[:, None, :]
    r2 = jnp.einsum("enh,hk->enk", h_nei, p["Ur_w"]) + p["Ur_b"]
    r = jax.nn.sigmoid(r1 + r2)
    sum_g = jnp.sum(r * h_nei, axis=1)
    pre_h = jnp.tanh(x @ p["Wh_x"] + sum_g @ p["Wh_h"] + p["Wh_b"])
    return (1.0 - z) * sum_h + z * pre_h


def agg_ref(x_vec, h_nei, p):
    sum_h = jnp.sum(h_nei, axis=1)
    return jnp.maximum(x_vec @ p["W_x"] + sum_h @ p["W_h"] + p["W_b"], 0.0)


# ----------------------------------------------------------------------------
# Tree structure + prop-order glue (mirrors the PyTorch module)
# ----------------------------------------------------------------------------
class TreeNode:
    def __init__(self, idx, wid):
        self.idx = idx
        self.wid = wid
        self.neighbors = []
        self.depth = 0


def link(a, b):
    a.neighbors.append(b)
    b.neighbors.append(a)


def get_prop_order(root):
    queue = deque([root])
    visited = {root.idx}
    root.depth = 0
    order1, order2 = [], []
    while queue:
        x = queue.popleft()
        for y in x.neighbors:
            if y.idx not in visited:
                queue.append(y)
                visited.add(y.idx)
                y.depth = x.depth + 1
                if y.depth > len(order1):
                    order1.append([])
                    order2.append([])
                order1[y.depth - 1].append((x, y))
                order2[y.depth - 1].append((y, x))
    return order2[::-1] + order1


# ----------------------------------------------------------------------------
# Host-side preprocessing: dense per-level index tables (built ONCE).
# ----------------------------------------------------------------------------
def _round8(n, minimum=8):
    n = max(int(n), 1)
    return max(minimum, ((n + 7) // 8) * 8)


def build_tables(root_batch):
    orders = [get_prop_order(root) for root in root_batch]
    max_depth = max(len(o) for o in orders)
    assert max_depth >= 1, "batch must contain at least one edge"

    edge_id = {}
    level_pairs = []
    for t in range(max_depth):
        pairs = []
        for order in orders:
            if t < len(order):
                pairs.extend(order[t])
        for nx, ny in pairs:
            edge_id[(nx.idx, ny.idx)] = len(edge_id)
        level_pairs.append(pairs)

    num_edges = len(edge_id)
    zero_slot = num_edges          # row that always stays zero (neighbor padding)
    trash_slot = num_edges + 1     # scatter target for padded rows; NEVER read
    msg_rows = _round8(num_edges + 2)

    T = max_depth
    Ep = _round8(max(len(p) for p in level_pairs))

    wid_tab = np.zeros((T, Ep, 1), np.int32)
    nb_tab = np.full((T, Ep * MAX_NB, 1), zero_slot, np.int32)
    out_tab = np.full((T, 1, Ep), trash_slot, np.int32)

    computed = set()
    for t, pairs in enumerate(level_pairs):
        for i, (nx, ny) in enumerate(pairs):
            out_tab[t, 0, i] = edge_id[(nx.idx, ny.idx)]
            wid_tab[t, i, 0] = nx.wid
            nb = [edge_id[(nz.idx, nx.idx)] for nz in nx.neighbors
                  if nz.idx != ny.idx]
            assert len(nb) <= MAX_NB, "node exceeds MAX_NB neighbors"
            for e in nb:
                assert e in computed, "message referenced before it is computed"
            for j, e in enumerate(nb):
                nb_tab[t, i * MAX_NB + j, 0] = e
        for nx, ny in pairs:
            computed.add(edge_id[(nx.idx, ny.idx)])

    N = len(root_batch)
    Naggp = _round8(N)
    awid_tab = np.zeros((Naggp, 1), np.int32)
    anb_tab = np.full((Naggp * MAX_NB, 1), zero_slot, np.int32)
    for i, root in enumerate(root_batch):
        awid_tab[i, 0] = root.wid
        nbs = [edge_id[(ny.idx, root.idx)] for ny in root.neighbors]
        assert len(nbs) <= MAX_NB
        for j, e in enumerate(nbs):
            anb_tab[i * MAX_NB + j, 0] = e

    return edge_id, wid_tab, nb_tab, out_tab, awid_tab, anb_tab, num_edges, msg_rows, N


# ----------------------------------------------------------------------------
# Forward passes
# ----------------------------------------------------------------------------
def jtnn_encoder_forward_pallas(root_batch, params):
    pp = pack_params(params)
    (edge_id, wid_tab, nb_tab, out_tab, awid_tab, anb_tab,
     num_edges, msg_rows, N) = build_tables(root_batch)

    # Single H2D transfer of all index tables, then ONE fused pallas_call.
    wid_tab, nb_tab, out_tab, awid_tab, anb_tab = jax.device_put(
        (jnp.asarray(wid_tab), jnp.asarray(nb_tab), jnp.asarray(out_tab),
         jnp.asarray(awid_tab), jnp.asarray(anb_tab)))

    msg, root = jtnn_fused_pallas(wid_tab, nb_tab, out_tab, awid_tab, anb_tab,
                                  pp, msg_rows)
    root_vecs = root[:N]

    # One bulk D2H transfer; build the (x, y) -> hidden dict on the host.
    msg_np = np.asarray(msg)
    h = {key: msg_np[eid] for key, eid in edge_id.items()}
    return h, root_vecs


def jtnn_encoder_forward_ref(root_batch, params):
    """Dict-based reference with the same semantics as the PyTorch module."""
    orders = [get_prop_order(root) for root in root_batch]
    h = {}
    max_depth = max(len(o) for o in orders)
    padding = jnp.zeros((HIDDEN,), jnp.float32)
    emb = params["embedding"]

    for t in range(max_depth):
        prop_list = []
        for order in orders:
            if t < len(order):
                prop_list.extend(order[t])

        cur_x, cur_h_nei = [], []
        for node_x, node_y in prop_list:
            cur_x.append(node_x.wid)
            h_nei = [h[(node_z.idx, node_x.idx)] for node_z in node_x.neighbors
                     if node_z.idx != node_y.idx]
            h_nei = h_nei + [padding] * (MAX_NB - len(h_nei))
            cur_h_nei.append(jnp.stack(h_nei, axis=0))

        cur_x_emb = jnp.take(emb, jnp.asarray(cur_x, jnp.int32), axis=0)
        cur_h_nei = jnp.stack(cur_h_nei, axis=0)            # (E, MAX_NB, H)
        new_h = gru_ref(cur_x_emb, cur_h_nei, params)
        for i, (nx, ny) in enumerate(prop_list):
            h[(nx.idx, ny.idx)] = new_h[i]

    x_idx, h_nei = [], []
    for node_x in root_batch:
        x_idx.append(node_x.wid)
        nei = [h[(node_y.idx, node_x.idx)] for node_y in node_x.neighbors]
        nei = nei + [padding] * (MAX_NB - len(nei))
        h_nei.append(jnp.stack(nei, axis=0))
    x_vec = jnp.take(emb, jnp.asarray(x_idx, jnp.int32), axis=0)
    h_nei = jnp.stack(h_nei, axis=0)
    root_vecs = agg_ref(x_vec, h_nei, params)
    return h, root_vecs


# ----------------------------------------------------------------------------
# Deterministic parameter init (shapes follow JTNNEncoder.__init__)
# ----------------------------------------------------------------------------
def init_params(key):
    ks = jax.random.split(key, 12)
    n = lambda k, shp: 0.1 * jax.random.normal(k, shp, jnp.float32)
    H = HIDDEN
    return {
        "embedding": n(ks[0], (VOCAB, H)),
        # W_z : Linear(2H -> H)   (split into x-part / h-part)
        "Wz_x": n(ks[1], (H, H)), "Wz_h": n(ks[2], (H, H)), "Wz_b": n(ks[3], (1, H)),
        # W_r : Linear(H -> H, bias=False)
        "Wr_w": n(ks[4], (H, H)),
        # U_r : Linear(H -> H)
        "Ur_w": n(ks[5], (H, H)), "Ur_b": n(ks[6], (1, H)),
        # W_h : Linear(2H -> H)
        "Wh_x": n(ks[7], (H, H)), "Wh_h": n(ks[8], (H, H)), "Wh_b": n(ks[9], (1, H)),
        # W   : Linear(2H -> H)  (node_aggregate)
        "W_x": n(ks[10], (H, H)), "W_h": n(ks[11], (H, H)),
        "W_b": jnp.zeros((1, H), jnp.float32),
    }


def pack_params(p):
    """Fuse weights into lane-dense blocks for single-matmul gate projections.

    Wg (2H, 4H): rows [0:H] act on x    -> [Wz_x | Wr_w | Wh_x | 0]
                 rows [H:2H] act on sum_h -> [Wz_h | 0   | 0    | 0]
    bg (1, 4H):  [Wz_b | Ur_b | Wh_b | 0]
    Wa (2H, H):  [W_x ; W_h] for the root aggregation.
    """
    H = HIDDEN
    zw = jnp.zeros((H, H), jnp.float32)
    zb = jnp.zeros((1, H), jnp.float32)
    Wg_top = jnp.concatenate([p["Wz_x"], p["Wr_w"], p["Wh_x"], zw], axis=1)
    Wg_bot = jnp.concatenate([p["Wz_h"], zw, zw, zw], axis=1)
    return {
        "embedding": p["embedding"],
        "Wg": jnp.concatenate([Wg_top, Wg_bot], axis=0),
        "bg": jnp.concatenate([p["Wz_b"], p["Ur_b"], p["Wh_b"], zb], axis=1),
        "Ur_w": p["Ur_w"],
        "Wh_h": p["Wh_h"],
        "Wa": jnp.concatenate([p["W_x"], p["W_h"]], axis=0),
        "Wa_b": p["W_b"],
    }


def build_batch():
    # Tree A: idx 0..3, edges 0-1, 1-2, 1-3  (root = 0)
    a = [TreeNode(0, 3), TreeNode(1, 7), TreeNode(2, 1), TreeNode(3, 11)]
    link(a[0], a[1]); link(a[1], a[2]); link(a[1], a[3])
    # Tree B: idx 4..6, chain 4-5-6 (root = 4)
    b = [TreeNode(4, 5), TreeNode(5, 9), TreeNode(6, 2)]
    link(b[0], b[1]); link(b[1], b[2])
    return [a[0], b[0]]


if __name__ == "__main__":
    params = init_params(jax.random.PRNGKey(0))
    root_batch = build_batch()

    h_pallas, root_vecs = jtnn_encoder_forward_pallas(root_batch, params)
    root_vecs = jax.block_until_ready(root_vecs)

    # Correctness check against a pure-JAX reference of the same semantics.
    h_ref, root_vecs_ref = jtnn_encoder_forward_ref(root_batch, params)
    assert root_vecs.shape == (len(root_batch), HIDDEN)
    assert set(h_pallas.keys()) == set(h_ref.keys())
    assert jnp.allclose(root_vecs, root_vecs_ref, atol=1e-4, rtol=1e-4)
    for k in h_ref:
        assert jnp.allclose(h_pallas[k], h_ref[k], atol=1e-4, rtol=1e-4)

    print("KERNEL_OK")
</pallas_src>

<mosaic_0001>
module attributes {stable_mosaic.version = 11 : i64} {
  func.func @_jtnn_kernel(%arg0: i32, %arg1: memref<1x8x1xi32, #tpu.memory_space<vmem>>, %arg2: memref<1x64x1xi32, #tpu.memory_space<vmem>>, %arg3: memref<1x1x8xi32, #tpu.memory_space<vmem>>, %arg4: memref<8x1xi32, #tpu.memory_space<vmem>>, %arg5: memref<64x1xi32, #tpu.memory_space<vmem>>, %arg6: memref<16x32xf32, #tpu.memory_space<vmem>>, %arg7: memref<64x128xf32, #tpu.memory_space<vmem>>, %arg8: memref<1x128xf32, #tpu.memory_space<vmem>>, %arg9: memref<32x32xf32, #tpu.memory_space<vmem>>, %arg10: memref<32x32xf32, #tpu.memory_space<vmem>>, %arg11: memref<64x32xf32, #tpu.memory_space<vmem>>, %arg12: memref<1x32xf32, #tpu.memory_space<vmem>>, %arg13: memref<16x32xf32, #tpu.memory_space<vmem>>, %arg14: memref<8x32xf32, #tpu.memory_space<vmem>>) attributes {dimension_semantics = [#tpu.dimension_semantics<arbitrary>], iteration_bounds = array<i64: 4>, scalar_prefetch = 0 : i64, scratch_operands = 0 : i64, tpu.core_type = #tpu.core_type<tc>, window_params = [{transform_indices = @transform_0, window_bounds = array<i64: 1, 8, 1>}, {transform_indices = @transform_1, window_bounds = array<i64: 1, 64, 1>}, {transform_indices = @transform_2, window_bounds = array<i64: 1, 1, 8>}, {pipeline_mode = #tpu.pipeline_mode<synchronous>, transform_indices = @transform_3, window_bounds = array<i64: 8, 1>}, {pipeline_mode = #tpu.pipeline_mode<synchronous>, transform_indices = @transform_4, window_bounds = array<i64: 64, 1>}, {pipeline_mode = #tpu.pipeline_mode<synchronous>, transform_indices = @transform_5, window_bounds = array<i64: 16, 32>}, {pipeline_mode = #tpu.pipeline_mode<synchronous>, transform_indices = @transform_6, window_bounds = array<i64: 64, 128>}, {pipeline_mode = #tpu.pipeline_mode<synchronous>, transform_indices = @transform_7, window_bounds = array<i64: 1, 128>}, {pipeline_mode = #tpu.pipeline_mode<synchronous>, transform_indices = @transform_8, window_bounds = array<i64: 32, 32>}, {pipeline_mode = #tpu.pipeline_mode<synchronous>, transform_indices = @transform_9, window_bounds = array<i64: 32, 32>}, {pipeline_mode = #tpu.pipeline_mode<synchronous>, transform_indices = @transform_10, window_bounds = array<i64: 64, 32>}, {pipeline_mode = #tpu.pipeline_mode<synchronous>, transform_indices = @transform_11, window_bounds = array<i64: 1, 32>}, {pipeline_mode = #tpu.pipeline_mode<synchronous>, transform_indices = @transform_12, window_bounds = array<i64: 16, 32>}, {pipeline_mode = #tpu.pipeline_mode<synchronous>, transform_indices = @transform_13, window_bounds = array<i64: 8, 32>}]} {
    %c0_i32 = arith.constant 0 : i32
    %0 = arith.cmpi eq, %arg0, %c0_i32 : i32
    %1 = arith.extui %0 : i1 to i32
    %c0_i32_0 = arith.constant 0 : i32
    %2 = arith.cmpi ne, %1, %c0_i32_0 : i32
    scf.if %2 {
      %cst_40 = arith.constant 0.000000e+00 : f32
      %82 = vector.broadcast %cst_40 : f32 to vector<16x32xf32>
      %c0_41 = arith.constant 0 : index
      %c0_42 = arith.constant 0 : index
      %83 = vector.load %arg13[%c0_41, %c0_42] : memref<16x32xf32, #tpu.memory_space<vmem>>, vector<16x32xf32>
      tpu.vector_store %arg13[%c0_41, %c0_42], %82 {strides = array<i32>} : memref<16x32xf32, #tpu.memory_space<vmem>>, vector<16x32xf32>,
      %cst_43 = arith.constant 0.000000e+00 : f32
      %84 = vector.broadcast %cst_43 : f32 to vector<8x32xf32>
      %c0_44 = arith.constant 0 : index
      %c0_45 = arith.constant 0 : index
      %85 = vector.load %arg14[%c0_44, %c0_45] : memref<8x32xf32, #tpu.memory_space<vmem>>, vector<8x32xf32>
      tpu.vector_store %arg14[%c0_44, %c0_45], %84 {strides = array<i32>} : memref<8x32xf32, #tpu.memory_space<vmem>>, vector<8x32xf32>,
    } else {
    }
    %c0 = arith.constant 0 : index
    %c0_1 = arith.constant 0 : index
    %3 = vector.load %arg13[%c0, %c0_1] : memref<16x32xf32, #tpu.memory_space<vmem>>, vector<16x32xf32>
    %c0_2 = arith.constant 0 : index
    %c0_3 = arith.constant 0 : index
    %c0_4 = arith.constant 0 : index
    %4 = vector.load %arg1[%c0_2, %c0_3, %c0_4] : memref<1x8x1xi32, #tpu.memory_space<vmem>>, vector<1x8x1xi32>
    %5 = vector.shape_cast %4 : vector<1x8x1xi32> to vector<8x1xi32>
    %6 = tpu.iota {dimensions = array<i32: 1>} : vector<8x16xi32>
    %7 = vector.broadcast %5 : vector<8x1xi32> to vector<8x16xi32>
    %8 = arith.cmpi eq, %6, %7 : vector<8x16xi32>
    %cst = arith.constant 1.000000e+00 : f32
    %cst_5 = arith.constant 0.000000e+00 : f32
    %9 = vector.broadcast %cst : f32 to vector<8x16xf32>
    %10 = vector.broadcast %cst_5 : f32 to vector<8x16xf32>
    %11 = arith.select %8, %9, %10 : vector<8x16xi1>, vector<8x16xf32>
    %c0_6 = arith.constant 0 : index
    %c0_7 = arith.constant 0 : index
    %12 = vector.load %arg6[%c0_6, %c0_7] : memref<16x32xf32, #tpu.memory_space<vmem>>, vector<16x32xf32>
    %cst_8 = arith.constant dense<0.000000e+00> : vector<8x32xf32>
    %13 = tpu.matmul %11, %12, %cst_8 {dimension_numbers = #tpu.dot_dimension_numbers<[1], [0], [0], [1], [0, 0, 1, 1], [], []>} : vector<8x16xf32>, vector<16x32xf32>, vector<8x32xf32> -> vector<8x32xf32>
    %c0_9 = arith.constant 0 : index
    %c0_10 = arith.constant 0 : index
    %c0_11 = arith.constant 0 : index
    %14 = vector.load %arg2[%c0_9, %c0_10, %c0_11] : memref<1x64x1xi32, #tpu.memory_space<vmem>>, vector<1x64x1xi32>
    %15 = vector.shape_cast %14 : vector<1x64x1xi32> to vector<64x1xi32>
    %16 = tpu.iota {dimensions = array<i32: 1>} : vector<64x16xi32>
    %17 = vector.broadcast %15 : vector<64x1xi32> to vector<64x16xi32>
    %18 = arith.cmpi eq, %16, %17 : vector<64x16xi32>
    %cst_12 = arith.constant 1.000000e+00 : f32
    %cst_13 = arith.constant 0.000000e+00 : f32
    %19 = vector.broadcast %cst_12 : f32 to vector<64x16xf32>
    %20 = vector.broadcast %cst_13 : f32 to vector<64x16xf32>
    %21 = arith.select %18, %19, %20 : vector<64x16xi1>, vector<64x16xf32>
    %cst_14 = arith.constant dense<0.000000e+00> : vector<64x32xf32>
    %22 = tpu.matmul %21, %3, %cst_14 {dimension_numbers = #tpu.dot_dimension_numbers<[1], [0], [0], [1], [0, 0, 1, 1], [], []>} : vector<64x16xf32>, vector<16x32xf32>, vector<64x32xf32> -> vector<64x32xf32>
    %23 = vector.shape_cast %22 : vector<64x32xf32> to vector<8x8x32xf32>
    %cst_15 = arith.constant dense<0.000000e+00> : vector<8x32xf32>
    %24 = vector.multi_reduction <add>, %23, %cst_15 [1] : vector<8x8x32xf32> to vector<8x32xf32>
    %25 = tpu.concatenate %13, %24 in 1 : vector<8x32xf32>, vector<8x32xf32> -> vector<8x64xf32>
    %c0_16 = arith.constant 0 : index
    %c0_17 = arith.constant 0 : index
    %26 = vector.load %arg7[%c0_16, %c0_17] : memref<64x128xf32, #tpu.memory_space<vmem>>, vector<64x128xf32>
    %cst_18 = arith.constant dense<0.000000e+00> : vector<8x128xf32>
    %27 = tpu.matmul %25, %26, %cst_18 {dimension_numbers = #tpu.dot_dimension_numbers<[1], [0], [0], [1], [0, 0, 1, 1], [], []>} : vector<8x64xf32>, vector<64x128xf32>, vector<8x128xf32> -> vector<8x128xf32>
    %c0_19 = arith.constant 0 : index
    %c0_20 = arith.constant 0 : index
    %28 = vector.load %arg8[%c0_19, %c0_20] : memref<1x128xf32, #tpu.memory_space<vmem>>, vector<1x128xf32>
    %29 = vector.extract_strided_slice %28 {offsets = [0, 0], sizes = [1, 32], strides = [1, 1]} : vector<1x128xf32> to vector<1x32xf32>
    %30 = vector.extract_strided_slice %28 {offsets = [0, 32], sizes = [1, 32], strides = [1, 1]} : vector<1x128xf32> to vector<1x32xf32>
    %31 = vector.extract_strided_slice %28 {offsets = [0, 64], sizes = [1, 32], strides = [1, 1]} : vector<1x128xf32> to vector<1x32xf32>
    %32 = vector.extract_strided_slice %27 {offsets = [0, 0], sizes = [8, 32], strides = [1, 1]} : vector<8x128xf32> to vector<8x32xf32>
    %33 = vector.broadcast %29 : vector<1x32xf32> to vector<8x32xf32>
    %34 = arith.addf %32, %33 : vector<8x32xf32>
    %35 = arith.negf %34 : vector<8x32xf32>
    %36 = math.exp %35 : vector<8x32xf32>
    %cst_21 = arith.constant 1.000000e+00 : f32
    %37 = vector.broadcast %cst_21 : f32 to vector<8x32xf32>
    %38 = arith.addf %37, %36 : vector<8x32xf32>
    %39 = arith.divf %37, %38 : vector<8x32xf32>
    %c0_22 = arith.constant 0 : index
    %c0_23 = arith.constant 0 : index
    %40 = vector.load %arg9[%c0_22, %c0_23] : memref<32x32xf32, #tpu.memory_space<vmem>>, vector<32x32xf32>
    %cst_24 = arith.constant dense<0.000000e+00> : vector<64x32xf32>
    %41 = tpu.matmul %22, %40, %cst_24 {dimension_numbers = #tpu.dot_dimension_numbers<[1], [0], [0], [1], [0, 0, 1, 1], [], []>} : vector<64x32xf32>, vector<32x32xf32>, vector<64x32xf32> -> vector<64x32xf32>
    %42 = vector.broadcast %30 : vector<1x32xf32> to vector<64x32xf32>
    %43 = arith.addf %41, %42 : vector<64x32xf32>
    %44 = vector.extract_strided_slice %27 {offsets = [0, 32], sizes = [8, 32], strides = [1, 1]} : vector<8x128xf32> to vector<8x32xf32>
    %45 = vector.shape_cast %44 : vector<8x32xf32> to vector<8x1x32xf32>
    %46 = vector.shape_cast %43 : vector<64x32xf32> to vector<8x8x32xf32>
    %47 = vector.broadcast %45 : vector<8x1x32xf32> to vector<8x8x32xf32>
    %48 = arith.addf %47, %46 : vector<8x8x32xf32>
    %49 = arith.negf %48 : vector<8x8x32xf32>
    %50 = math.exp %49 : vector<8x8x32xf32>
    %cst_25 = arith.constant 1.000000e+00 : f32
    %51 = vector.broadcast %cst_25 : f32 to vector<8x8x32xf32>
    %52 = arith.addf %51, %50 : vector<8x8x32xf32>
    %53 = arith.divf %51, %52 : vector<8x8x32xf32>
    %54 = arith.mulf %53, %23 : vector<8x8x32xf32>
    %cst_26 = arith.constant dense<0.000000e+00> : vector<8x32xf32>
    %55 = vector.multi_reduction <add>, %54, %cst_26 [1] : vector<8x8x32xf32> to vector<8x32xf32>
    %56 = vector.extract_strided_slice %27 {offsets = [0, 64], sizes = [8, 32], strides = [1, 1]} : vector<8x128xf32> to vector<8x32xf32>
    %c0_27 = arith.constant 0 : index
    %c0_28 = arith.constant 0 : index
    %57 = vector.load %arg10[%c0_27, %c0_28] : memref<32x32xf32, #tpu.memory_space<vmem>>, vector<32x32xf32>
    %cst_29 = arith.constant dense<0.000000e+00> : vector<8x32xf32>
    %58 = tpu.matmul %55, %57, %cst_29 {dimension_numbers = #tpu.dot_dimension_numbers<[1], [0], [0], [1], [0, 0, 1, 1], [], []>} : vector<8x32xf32>, vector<32x32xf32>, vector<8x32xf32> -> vector<8x32xf32>
    %59 = arith.addf %56, %58 : vector<8x32xf32>
    %60 = vector.broadcast %31 : vector<1x32xf32> to vector<8x32xf32>
    %61 = arith.addf %59, %60 : vector<8x32xf32>
    %62 = math.tanh %61 : vector<8x32xf32>
    %cst_30 = arith.constant 1.000000e+00 : f32
    %63 = vector.broadcast %cst_30 : f32 to vector<8x32xf32>
    %64 = arith.subf %63, %39 : vector<8x32xf32>
    %65 = arith.mulf %64, %24 : vector<8x32xf32>
    %66 = arith.mulf %39, %62 : vector<8x32xf32>
    %67 = arith.addf %65, %66 : vector<8x32xf32>
    %c0_31 = arith.constant 0 : index
    %c0_32 = arith.constant 0 : index
    %c0_33 = arith.constant 0 : index
    %68 = vector.load %arg3[%c0_31, %c0_32, %c0_33] : memref<1x1x8xi32, #tpu.memory_space<vmem>>, vector<1x1x8xi32>
    %69 = vector.shape_cast %68 : vector<1x1x8xi32> to vector<1x8xi32>
    %70 = tpu.iota {dimensions = array<i32: 0>} : vector<16x8xi32>
    %71 = vector.broadcast %69 : vector<1x8xi32> to vector<16x8xi32>
    %72 = arith.cmpi eq, %70, %71 : vector<16x8xi32>
    %cst_34 = arith.constant 1.000000e+00 : f32
    %cst_35 = arith.constant 0.000000e+00 : f32
    %73 = vector.broadcast %cst_34 : f32 to vector<16x8xf32>
    %74 = vector.broadcast %cst_35 : f32 to vector<16x8xf32>
    %75 = arith.select %72, %73, %74 : vector<16x8xi1>, vector<16x8xf32>
    %cst_36 = arith.constant dense<0.000000e+00> : vector<16x32xf32>
    %76 = tpu.matmul %75, %67, %cst_36 {dimension_numbers = #tpu.dot_dimension_numbers<[1], [0], [0], [1], [0, 0, 1, 1], [], []>} : vector<16x8xf32>, vector<8x32xf32>, vector<16x32xf32> -> vector<16x32xf32>
    %77 = arith.addf %3, %76 : vector<16x32xf32>
    %c0_37 = arith.constant 0 : index
    %c0_38 = arith.constant 0 : index
    %78 = vector.load %arg13[%c0_37, %c0_38] : memref<16x32xf32, #tpu.memory_space<vmem>>, vector<16x32xf32>
    tpu.vector_store %arg13[%c0_37, %c0_38], %77 {strides = array<i32>} : memref<16x32xf32, #tpu.memory_space<vmem>>, vector<16x32xf32>,
    %c3_i32 = arith.constant 3 : i32
    %79 = arith.cmpi eq, %arg0, %c3_i32 : i32
    %80 = arith.extui %79 : i1 to i32
    %c0_i32_39 = arith.constant 0 : i32
    %81 = arith.cmpi ne, %80, %c0_i32_39 : i32
    scf.if %81 {
      %c0_40 = arith.constant 0 : index
      %c0_41 = arith.constant 0 : index
      %82 = vector.load %arg13[%c0_40, %c0_41] : memref<16x32xf32, #tpu.memory_space<vmem>>, vector<16x32xf32>
      %c0_42 = arith.constant 0 : index
      %c0_43 = arith.constant 0 : index
      %83 = vector.load %arg4[%c0_42, %c0_43] : memref<8x1xi32, #tpu.memory_space<vmem>>, vector<8x1xi32>
      %84 = tpu.iota {dimensions = array<i32: 1>} : vector<8x16xi32>
      %85 = vector.broadcast %83 : vector<8x1xi32> to vector<8x16xi32>
      %86 = arith.cmpi eq, %84, %85 : vector<8x16xi32>
      %cst_44 = arith.constant 1.000000e+00 : f32
      %cst_45 = arith.constant 0.000000e+00 : f32
      %87 = vector.broadcast %cst_44 : f32 to vector<8x16xf32>
      %88 = vector.broadcast %cst_45 : f32 to vector<8x16xf32>
      %89 = arith.select %86, %87, %88 : vector<8x16xi1>, vector<8x16xf32>
      %c0_46 = arith.constant 0 : index
      %c0_47 = arith.constant 0 : index
      %90 = vector.load %arg6[%c0_46, %c0_47] : memref<16x32xf32, #tpu.memory_space<vmem>>, vector<16x32xf32>
      %cst_48 = arith.constant dense<0.000000e+00> : vector<8x32xf32>
      %91 = tpu.matmul %89, %90, %cst_48 {dimension_numbers = #tpu.dot_dimension_numbers<[1], [0], [0], [1], [0, 0, 1, 1], [], []>} : vector<8x16xf32>, vector<16x32xf32>, vector<8x32xf32> -> vector<8x32xf32>
      %c0_49 = arith.constant 0 : index
      %c0_50 = arith.constant 0 : index
      %92 = vector.load %arg5[%c0_49, %c0_50] : memref<64x1xi32, #tpu.memory_space<vmem>>, vector<64x1xi32>
      %93 = tpu.iota {dimensions = array<i32: 1>} : vector<64x16xi32>
      %94 = vector.broadcast %92 : vector<64x1xi32> to vector<64x16xi32>
      %95 = arith.cmpi eq, %93, %94 : vector<64x16xi32>
      %cst_51 = arith.constant 1.000000e+00 : f32
      %cst_52 = arith.constant 0.000000e+00 : f32
      %96 = vector.broadcast %cst_51 : f32 to vector<64x16xf32>
      %97 = vector.broadcast %cst_52 : f32 to vector<64x16xf32>
      %98 = arith.select %95, %96, %97 : vector<64x16xi1>, vector<64x16xf32>
      %cst_53 = arith.constant dense<0.000000e+00> : vector<64x32xf32>
      %99 = tpu.matmul %98, %82, %cst_53 {dimension_numbers = #tpu.dot_dimension_numbers<[1], [0], [0], [1], [0, 0, 1, 1], [], []>} : vector<64x16xf32>, vector<16x32xf32>, vector<64x32xf32> -> vector<64x32xf32>
      %100 = vector.shape_cast %99 : vector<64x32xf32> to vector<8x8x32xf32>
      %cst_54 = arith.constant dense<0.000000e+00> : vector<8x32xf32>
      %101 = vector.multi_reduction <add>, %100, %cst_54 [1] : vector<8x8x32xf32> to vector<8x32xf32>
      %102 = tpu.concatenate %91, %101 in 1 : vector<8x32xf32>, vector<8x32xf32> -> vector<8x64xf32>
      %c0_55 = arith.constant 0 : index
      %c0_56 = arith.constant 0 : index
      %103 = vector.load %arg11[%c0_55, %c0_56] : memref<64x32xf32, #tpu.memory_space<vmem>>, vector<64x32xf32>
      %cst_57 = arith.constant dense<0.000000e+00> : vector<8x32xf32>
      %104 = tpu.matmul %102, %103, %cst_57 {dimension_numbers = #tpu.dot_dimension_numbers<[1], [0], [0], [1], [0, 0, 1, 1], [], []>} : vector<8x64xf32>, vector<64x32xf32>, vector<8x32xf32> -> vector<8x32xf32>
      %c0_58 = arith.constant 0 : index
      %c0_59 = arith.constant 0 : index
      %105 = vector.load %arg12[%c0_58, %c0_59] : memref<1x32xf32, #tpu.memory_space<vmem>>, vector<1x32xf32>
      %106 = vector.broadcast %105 : vector<1x32xf32> to vector<8x32xf32>
      %107 = arith.addf %104, %106 : vector<8x32xf32>
      %cst_60 = arith.constant 0.000000e+00 : f32
      %108 = vector.broadcast %cst_60 : f32 to vector<8x32xf32>
      %109 = arith.maximumf %107, %108 : vector<8x32xf32>
      %c0_61 = arith.constant 0 : index
      %c0_62 = arith.constant 0 : index
      %110 = vector.load %arg14[%c0_61, %c0_62] : memref<8x32xf32, #tpu.memory_space<vmem>>, vector<8x32xf32>
      tpu.vector_store %arg14[%c0_61, %c0_62], %109 {strides = array<i32>} : memref<8x32xf32, #tpu.memory_space<vmem>>, vector<8x32xf32>,
    } else {
    }
    return
  }
  func.func @transform_0(%arg0: i32) -> (i32, i32, i32) {
    %c0_i32 = arith.constant 0 : i32
    %c0_i32_0 = arith.constant 0 : i32
    %c0_i32_1 = arith.constant 0 : i32
    return %arg0, %c0_i32, %c0_i32_0 : i32, i32, i32
  }
  func.func @transform_1(%arg0: i32) -> (i32, i32, i32) {
    %c0_i32 = arith.constant 0 : i32
    %c0_i32_0 = arith.constant 0 : i32
    %c0_i32_1 = arith.constant 0 : i32
    return %arg0, %c0_i32, %c0_i32_0 : i32, i32, i32
  }
  func.func @transform_2(%arg0: i32) -> (i32, i32, i32) {
    %c0_i32 = arith.constant 0 : i32
    %c0_i32_0 = arith.constant 0 : i32
    %c0_i32_1 = arith.constant 0 : i32
    return %arg0, %c0_i32, %c0_i32_0 : i32, i32, i32
  }
  func.func @transform_3(%arg0: i32) -> (i32, i32) {
    %c0_i32 = arith.constant 0 : i32
    %c0_i32_0 = arith.constant 0 : i32
    %c0_i32_1 = arith.constant 0 : i32
    return %c0_i32, %c0_i32_0 : i32, i32
  }
  func.func @transform_4(%arg0: i32) -> (i32, i32) {
    %c0_i32 = arith.constant 0 : i32
    %c0_i32_0 = arith.constant 0 : i32
    %c0_i32_1 = arith.constant 0 : i32
    return %c0_i32, %c0_i32_0 : i32, i32
  }
  func.func @transform_5(%arg0: i32) -> (i32, i32) {
    %c0_i32 = arith.constant 0 : i32
    %c0_i32_0 = arith.constant 0 : i32
    %c0_i32_1 = arith.constant 0 : i32
    return %c0_i32, %c0_i32_0 : i32, i32
  }
  func.func @transform_6(%arg0: i32) -> (i32, i32) {
    %c0_i32 = arith.constant 0 : i32
    %c0_i32_0 = arith.constant 0 : i32
    %c0_i32_1 = arith.constant 0 : i32
    return %c0_i32, %c0_i32_0 : i32, i32
  }
  func.func @transform_7(%arg0: i32) -> (i32, i32) {
    %c0_i32 = arith.constant 0 : i32
    %c0_i32_0 = arith.constant 0 : i32
    %c0_i32_1 = arith.constant 0 : i32
    return %c0_i32, %c0_i32_0 : i32, i32
  }
  func.func @transform_8(%arg0: i32) -> (i32, i32) {
    %c0_i32 = arith.constant 0 : i32
    %c0_i32_0 = arith.constant 0 : i32
    %c0_i32_1 = arith.constant 0 : i32
    return %c0_i32, %c0_i32_0 : i32, i32
  }
  func.func @transform_9(%arg0: i32) -> (i32, i32) {
    %c0_i32 = arith.constant 0 : i32
    %c0_i32_0 = arith.constant 0 : i32
    %c0_i32_1 = arith.constant 0 : i32
    return %c0_i32, %c0_i32_0 : i32, i32
  }
  func.func @transform_10(%arg0: i32) -> (i32, i32) {
    %c0_i32 = arith.constant 0 : i32
    %c0_i32_0 = arith.constant 0 : i32
    %c0_i32_1 = arith.constant 0 : i32
    return %c0_i32, %c0_i32_0 : i32, i32
  }
  func.func @transform_11(%arg0: i32) -> (i32, i32) {
    %c0_i32 = arith.constant 0 : i32
    %c0_i32_0 = arith.constant 0 : i32
    %c0_i32_1 = arith.constant 0 : i32
    return %c0_i32, %c0_i32_0 : i32, i32
  }
  func.func @transform_12(%arg0: i32) -> (i32, i32) {
    %c0_i32 = arith.constant 0 : i32
    %c0_i32_0 = arith.constant 0 : i32
    %c0_i32_1 = arith.constant 0 : i32
    return %c0_i32, %c0_i32_0 : i32, i32
  }
  func.func @transform_13(%arg0: i32) -> (i32, i32) {
    %c0_i32 = arith.constant 0 : i32
    %c0_i32_0 = arith.constant 0 : i32
    %c0_i32_1 = arith.constant 0 : i32
    return %c0_i32, %c0_i32_0 : i32, i32
  }
}

</mosaic_0001>

<bundles_post_ra>
// kernel: tpu_custom_call.1
= control target key start
LH: loop header
LB: loop body
LE: loop exit
PB: predicated region body
PF: predicated region fallthrough
CT: control target
= control target key end

     0   :  { %19 = vsyncpa [#allocation3], 0  ;;  %s2997_s0 = inlined_call_operand.vmem [shape: s32[4,8,1], index: 0, kind: input, shape index: {}]   ;;  %s2998_s1 = inlined_call_operand.vmem [shape: s32[4,64,1], index: 1, kind: input, shape index: {}]   ;;  %s2999_s2 = inlined_call_operand.vmem [shape: s32[4,1,8], index: 2, kind: input, shape index: {}]   ;;  %s3000_s3 = inlined_call_operand.vmem [shape: s32[8,1], index: 3, kind: input, shape index: {}]   ;;  %s3001_s4 = inlined_call_operand.vmem [shape: s32[64,1], index: 4, kind: input, shape index: {}]   ;;  %s3002_s5 = inlined_call_operand.vmem [shape: f32[16,32], index: 5, kind: input, shape index: {}]   ;;  %s3003_s6 = inlined_call_operand.vmem [shape: f32[64,128], index: 6, kind: input, shape index: {}]   ;;  %s3004_s7 = inlined_call_operand.vmem [shape: f32[1,128], index: 7, kind: input, shape index: {}]   ;;  %s3005_s8 = inlined_call_operand.vmem [shape: f32[32,32], index: 8, kind: input, shape index: {}]   ;;  %s3006_s9 = inlined_call_operand.vmem [shape: f32[32,32], index: 9, kind: input, shape index: {}]   ;;  %s3007_s10 = inlined_call_operand.vmem [shape: f32[64,32], index: 10, kind: input, shape index: {}]   ;;  %s3008_s11 = inlined_call_operand.vmem [shape: f32[1,32], index: 11, kind: input, shape index: {}]   ;;  %s3009_s12 = inlined_call_operand.hbm [shape: f32[16,32], index: 12, kind: output, shape index: {0}]   ;;  %s3010_s13 = inlined_call_operand.hbm [shape: f32[8,32], index: 13, kind: output, shape index: {1}]  }
   0x1   :  { %20 = vsyncpa [#allocation5], 0  ;;  %s2568_s25 = smov 0  }
   0x2 LB: > { %s2574_s26 = sadd.s32 4294967295, %s2478_s25   ;;  %p2040_p0 = scmp.ge.s32.totalorder %s2478_s25, 1  ;;  %s2478_s25 = sphi %s2568_s25, %s26_s25  }
   0x3   : > { %p399_p1 = scmp.lt.s32.totalorder %s2478_s25, 5 }
   0x5   : > { %p400_p2 = pnand %p2040_p0, %p399_p1 }
   0x6   : > { %p445_p3 = scmp.lt.s32.totalorder (!%p400_p2), %s2574_s26, 3  ;;  %p2044_p4 = scmp.ne.s32.totalorder (!%p400_p2), %s2574_s26, 0 }
   0x7   : > { %403 = sbr.rel (%p400_p2) target bundleno = 2333 (0x91d), region = 68 }
   0xe   : > { %s2580_s27 = scalar_select %p445_p3, %s2574_s26, 3 }
   0xf   : > { %460 = sbr.rel (%p2044_p4) target bundleno = 22 (0x16), region = 72  ;;  %vm461_vm0 = vcmask (!%p2044_p4), 261120   ;;  %v2480_v0 = vmov (!%p2044_p4), 0.0  }
  0x10   : > { %s2041_s28 = sshll.u32 %s2580_s27, 3  ;;  %s2095_s29 = sshll.u32 %s2580_s27, 6  ;;  %462 = vst.msk [vmem:[#allocation2] sm:$0xff] (!%p2044_p4), %vm461_vm0, %v2480_v0  ;;  %463 = vst.msk [vmem:[#allocation2 + $0x8] sm:$0xff] (!%p2044_p4), %vm461_vm0, %v2480_v0 }
  0x11   : > { %s2587_s15 = scalar_lea.vmem %s2997_s0, %s2041_s28  ;;  %s2592_s18 = scalar_lea.vmem %s2998_s1, %s2095_s29  ;;  %464 = vst.msk [vmem:[#allocation4] sm:$0xff] (!%p2044_p4), %vm461_vm0, %v2480_v0 }
  0x12   : > { %s456_s21 = scalar_lea.vmem %s2999_s2, %s2580_s27 }
  0x16 PF: > { %v553_v1 = vld [vmem:[%s2592_s18 + $0x10] sm:$0xff]  ;;  %v551_v2 = vld [vmem:[%s2592_s18] sm:$0xff]  ;;  %v2481_v3 = vmov 0   ;;  %v554_v4 = vld [vmem:[%s2592_s18 + $0x18] sm:$0xff]  ;;  %v2482_v17 = vmov 0.0|0.0   ;;  %vm2483_vm1 = vmmov 0   ;;  %v468_v22 = vlaneseq }
  0x17   : > { %2371 = vset.pattern.permute.xlu1 %v2481_v3  ;;  %2370 = vset.pattern.permute.xlu0 %v2481_v3  ;;  %v552_v5 = vld [vmem:[%s2592_s18 + $0x8] sm:$0xff]  ;;  %v2603_v6 = vld [vmem:[#allocation2] sm:$0xff]  ;;  %v558_v11 = vld [vmem:[%s2592_s18 + $0x38] sm:$0xff]  ;;  %v2484_v18 = vmov 0.0   ;;  %vm477_vm2 = vcmask 130048   ;;  %s2485_s30 = smov 96  }
  0x18   : > { %566 = vperm.xlu1 %2371, %v553_v1   ;;  %560 = vperm.xlu0 %2370, %v551_v2   ;;  %v2605_v7 = vld [vmem:[#allocation2 + $0x8] sm:$0xff]  ;;  %v555_v10 = vld [vmem:[%s2592_s18 + $0x20] sm:$0xff]  ;;  %v557_v12 = vld [vmem:[%s2592_s18 + $0x30] sm:$0xff]  ;;  %v2631_v23 = vand.u32 127, %v468_v22  ;;  %vm728_vm12 = vcmask 261120   ;;  %vm793_vm13 = vcmask 1041409  }
  0x19   : > { %v2283_v8 = vpack.c.bf16 %v2605_v7, %v2603_v6  ;;  %v556_v9 = vld [vmem:[%s2592_s18 + $0x28] sm:$0xff]  ;;  %v475_v13 = vld [vmem:[%s3002_s5] sm:$0xff]  ;;  %2280 = vmatprep.subr.bf16.mxu0 %v2482_v17  ;;  %2164 = vmatprep.mubr.msk.f32.mxu0 %vm2483_vm1, %v2484_v18  ;;  %v909_v27 = vld [vmem:[%s3005_s8 + $0x10] sm:$0xff]  ;;  %vm795_vm14 = vcmask 1042434   ;;  %vm797_vm15 = vcmask 1043459   ;;  %vm799_vm0 = vcmask 1044484  }
  0x1a   : > { %v476_v14 = vld [vmem:[%s3002_s5 + $0x8] sm:$0xff]  ;;  %v467_v15 = vld [vmem:[%s2587_s15] sm:$0xff]  ;;  %v910_v28 = vld [vmem:[%s3005_s8 + $0x18] sm:$0xff]  ;;  %s2486_s14 = smov 32   ;;  %s2488_s24 = smov 64  }
  0x1b   : > { %2284 = vmatprep.subr.bf16.mxu1 %v2283_v8  ;;  %v2281_v16 = vpack.c.bf16 %v476_v14, %v475_v13  ;;  %v907_v19 = vld [vmem:[%s3005_s8] sm:$0xff]  ;;  %v908_v20 = vld [vmem:[%s3005_s8 + $0x8] sm:$0xff]  ;;  %v2303_v32 = vpack.c.bf16 %v910_v28, %v909_v27  ;;  %v813_v49 = vld [vmem:[%s3003_s6 + $0x10] sm:$0xff]  ;;  %p2077_p5 = scmp.ne.s32.totalorder %s2574_s26, 3 }
  0x1c   : > { %569 = vperm.xlu1 %2371, %v554_v4   ;;  %563 = vperm.xlu0 %2370, %v552_v5   ;;  %v2299_v21 = vpack.c.bf16 %v908_v20, %v907_v19  ;;  %v2671_v45 = vld [vmem:[%s3004_s7] ss:$0 sm:$0xff]  ;;  %v812_v47 = vld [vmem:[%s3003_s6 + $0x8] sm:$0xff]  ;;  %v814_v50 = vld [vmem:[%s3003_s6 + $0x18] sm:$0xff]  ;;  %s2493_s19 = smov (!%p2077_p5), 32  }
  0x1d   : > { %2286 = vmatpush3.bf16.msra.mxu1 %v2283_v8  ;;  %2282 = vmatpush3.bf16.msra.mxu0 %v2281_v16  ;;  %v811_v46 = vld [vmem:[%s3003_s6] sm:$0xff]  ;;  %v2291_v51 = vpack.c.bf16 %v814_v50, %v813_v49  ;;  %v816_v53 = vld [vmem:[%s3003_s6 + $0x28] sm:$0xff]  ;;  %v817_v55 = vld [vmem:[%s3003_s6 + $0x30] sm:$0xff] }
  0x1e   : > { %2287 = vmatprep.subr.bf16.mxu0 %v2482_v17  ;;  %2300 = vmatprep.subr.bf16.mxu1 %v2299_v21  ;;  %v2288_v48 = vpack.c.bf16 %v812_v47, %v811_v46  ;;  %v815_v52 = vld [vmem:[%s3003_s6 + $0x20] sm:$0xff]  ;;  %v818_v56 = vld [vmem:[%s3003_s6 + $0x38] sm:$0xff] }
  0x1f   : > { %v2294_v54 = vpack.c.bf16 %v816_v53, %v815_v52  ;;  %v2297_v57 = vpack.c.bf16 %v818_v56, %v817_v55 }
  0x20   : > { %575 = vperm.xlu1 %2371, %v556_v9   ;;  %572 = vperm.xlu0 %2370, %v555_v10  }
  0x24   : > { %581 = vperm.xlu1 %2371, %v558_v11   ;;  %578 = vperm.xlu0 %2370, %v557_v12  }
  0x28   : > { %471 = vperm.xlu0 %2370, %v467_v15  }
  0x2c   : > { %911 = vrot.lane.b32.xlu0 %v2671_v45, %s2485_s30 }
  0x97   : > { %v567_v24 = vpop.permute.xlu1 %566  ;;  %v561_v25 = vpop.permute.xlu0 %560 }
  0x98   : > { %vm583_vm3 = vcmp.eq.s32.totalorder %v2631_v23, %v561_v25  ;;  %vm585_vm4 = vcmp.eq.s32.totalorder %v2631_v23, %v567_v24 }
  0x99   : > { %v591_v26 = vsel %vm583_vm3, 1.0, %v2484_v18  ;;  %v593_v31 = vsel %vm585_vm4, 1.0, %v2484_v18  ;;  %vm801_vm3 = vcmask 1045509   ;;  %vm803_vm4 = vcmask 1046534  }
  0x9a   : > { %2171 = vmatprep.mubr.msk.f32.mxu1 %vm477_vm2, %v591_v26 }
  0x9b   : > { %v570_v29 = vpop.permute.xlu1 %569  ;;  %v564_v30 = vpop.permute.xlu0 %563 }
  0x9c   : > { %vm584_vm5 = vcmp.eq.s32.totalorder %v2631_v23, %v564_v30  ;;  %vm586_vm6 = vcmp.eq.s32.totalorder %v2631_v23, %v570_v29 }
  0x9d   : > { %v592_v33 = vsel %vm584_vm5, 1.0, %v2484_v18  ;;  %v594_v36 = vsel %vm586_vm6, 1.0, %v2484_v18  ;;  %vm805_vm5 = vcmask 1047559   ;;  %vm819_vm6 = vcmask 523264  }
  0x9e   : > { %2172 = vmatmul.mubr.msk.f32.vlgmr.msra.gmra.mrb[0].mxu1 %vm477_vm2, %v592_v33 }
  0x9f   : > { %v576_v34 = vpop.permute.xlu1 %575  ;;  %v573_v35 = vpop.permute.xlu0 %572  ;;  %2174 = vmatprep.mubr.msk.f32.mxu1 %vm477_vm2, %v593_v31  ;;  %2302 = vmatpush3.bf16.msra.mxu1 %v2299_v21 }
  0xa0   : > { %vm587_vm7 = vcmp.eq.s32.totalorder %v2631_v23, %v573_v35  ;;  %2304 = vmatprep.subr.bf16.mxu1 %v2303_v32  ;;  %vm588_vm8 = vcmp.eq.s32.totalorder %v2631_v23, %v576_v34 }
  0xa1   : > { %v595_v37 = vsel %vm587_vm7, 1.0, %v2484_v18  ;;  %v596_v40 = vsel %vm588_vm8, 1.0, %v2484_v18  ;;  %vm1431_vm8 = vcmask 64512  }
  0xa2   : > { %2175 = vmatmul.mubr.msk.f32.gmra.mrb[2].mxu1 %vm477_vm2, %v594_v36 }
  0xa3   : > { %v582_v38 = vpop.permute.xlu1 %581  ;;  %v579_v39 = vpop.permute.xlu0 %578  ;;  %2177 = vmatprep.mubr.msk.f32.mxu1 %vm477_vm2, %v595_v37  ;;  %2306 = vmatpush3.bf16.msra.mxu1 %v2303_v32 }
  0xa4   : > { %vm589_vm9 = vcmp.eq.s32.totalorder %v2631_v23, %v579_v39  ;;  %vm590_vm10 = vcmp.eq.s32.totalorder %v2631_v23, %v582_v38 }
  0xa5   : > { %v597_v41 = vsel %vm589_vm9, 1.0, %v2484_v18  ;;  %v598_v43 = vsel %vm590_vm10, 1.0, %v2484_v18  ;;  %vm2491_vm10 = vmmov (!%p2077_p5), 0  }
  0xa6   : > { %2178 = vmatmul.mubr.msk.f32.gmra.mrb[4].mxu1 %vm477_vm2, %v596_v40 }
  0xa7   : > { %v472_v42 = vpop.permute.xlu0 %471  ;;  %2180 = vmatprep.mubr.msk.f32.mxu1 %vm477_vm2, %v597_v41 }
  0xa8   : > { %vm473_vm11 = vcmp.eq.s32.totalorder %v2631_v23, %v472_v42 }
  0xa9   : > { %v474_v44 = vsel %vm473_vm11, 1.0, %v2484_v18 }
  0xaa   : > { %2165 = vmatmul.mubr.msk.f32.vlgmr.msra.gmra.mrb[0].mxu0 %vm477_vm2, %v474_v44  ;;  %2181 = vmatmul.mubr.msk.f32.gmra.mrb[6].mxu1 %vm477_vm2, %v598_v43 }
  0xab   : > { %2199 = vmatprep.mubr.msk.f32.mxu0 %vm2483_vm1, %v2484_v18  ;;  %2289 = vmatpush3.bf16.msra.mxu0 %v2288_v48 }
  0xac   : > { %2290 = vmatprep.subr.bf16.mxu0 %v2482_v17 }
  0xaf   : > { %2292 = vmatpush3.bf16.msra.mxu0 %v2291_v51 }
  0xb0   : > { %2293 = vmatprep.subr.bf16.mxu0 %v2482_v17 }
  0xb3   : > { %2295 = vmatpush3.bf16.msra.mxu0 %v2294_v54 }
  0xb4   : > { %2296 = vmatprep.subr.bf16.mxu0 %v2482_v17 }
  0xb7   : > { %2298 = vmatpush3.bf16.msra.mxu0 %v2297_v57 }
  0xb8   : > { %2307 = vmatprep.subr.bf16.mxu0 %v2482_v17 }
 0x171   : > { %v2703_v58 = vpop.f32.mrb[0].mxu1 }
 0x172   : > { %v736_v59 = vsel %vm728_vm12, %v2703_v58, 0.0  ;;  %v2707_v60 = vpop.f32.mrb[1].mxu1 }
 0x173   : > { %v737_v61 = vrot.slane %v736_v59, 4  ;;  %v729_v62 = vsel %vm728_vm12, %v2707_v60, 0.0  ;;  %2210 = vmatprep.mubr.msk.f32.mxu1 %vm728_vm12, %v2707_v60 }
 0x174   : > { %v730_v63 = vrot.slane %v729_v62, 4  ;;  %2211 = vmatmul.mubr.msk.f32.vlgmr.msra.gmra.mrb[8].mxu1 %vm728_vm12, %v2703_v58 }
 0x175   : > { %v738_v0 = vadd.f32 %v737_v61, %v736_v59  ;;  %v2715_v1 = vpop.f32.mrb[2].mxu1 }
 0x176   : > { %v731_v2 = vadd.f32 %v730_v63, %v729_v62  ;;  %v750_v3 = vsel %vm728_vm12, %v2715_v1, 0.0  ;;  %v2719_v4 = vpop.f32.mrb[3].mxu1 }
 0x177   : > { %v739_v5 = vrot.slane %v738_v0, 2  ;;  %v751_v8 = vrot.slane %v750_v3, 4  ;;  %v743_v9 = vsel %vm728_vm12, %v2719_v4, 0.0  ;;  %2213 = vmatprep.mubr.msk.f32.mxu1 %vm728_vm12, %v2719_v4 }
 0x178   : > { %v732_v10 = vrot.slane %v731_v2, 2  ;;  %v744_v11 = vrot.slane %v743_v9, 4  ;;  %2214 = vmatmul.mubr.msk.f32.gmra.mrb[10].mxu1 %vm728_vm12, %v2715_v1 }
 0x179   : > { %v740_v12 = vadd.f32 %v739_v5, %v738_v0  ;;  %v752_v13 = vadd.f32 %v751_v8, %v750_v3  ;;  %v2727_v14 = vpop.f32.mrb[4].mxu1 }
 0x17a   : > { %v733_v15 = vadd.f32 %v732_v10, %v731_v2  ;;  %v745_v16 = vadd.f32 %v744_v11, %v743_v9  ;;  %v764_v19 = vsel %vm728_vm12, %v2727_v14, 0.0  ;;  %v2731_v20 = vpop.f32.mrb[5].mxu1 }
 0x17b   : > { %v741_v21 = vrot.slane %v740_v12, 1  ;;  %v753_v24 = vrot.slane %v752_v13, 2  ;;  %v765_v25 = vrot.slane %v764_v19, 4  ;;  %v757_v26 = vsel %vm728_vm12, %v2731_v20, 0.0  ;;  %2216 = vmatprep.mubr.msk.f32.mxu1 %vm728_vm12, %v2731_v20 }
 0x17c   : > { %v734_v27 = vrot.slane %v733_v15, 1  ;;  %v746_v28 = vrot.slane %v745_v16, 2  ;;  %v758_v29 = vrot.slane %v757_v26, 4  ;;  %2217 = vmatmul.mubr.msk.f32.gmra.mrb[12].mxu1 %vm728_vm12, %v2727_v14 }
 0x17d   : > { %v742_v30 = vadd.f32 %v741_v21, %v740_v12  ;;  %v754_v31 = vadd.f32 %v753_v24, %v752_v13  ;;  %v766_v32 = vadd.f32 %v765_v25, %v764_v19  ;;  %v547_v33 = vpop.f32.mrb[0].mxu0  ;;  %v2739_v34 = vpop.f32.mrb[6].mxu1 }
 0x17e   : > { %v735_v35 = vadd.f32 %v734_v27, %v733_v15  ;;  %v747_v36 = vadd.f32 %v746_v28, %v745_v16  ;;  %v759_v37 = vadd.f32 %v758_v29, %v757_v26  ;;  %v778_v38 = vsel %vm728_vm12, %v2739_v34, 0.0  ;;  %v2166_v39 = vpop.f32.mrb[1].mxu0  ;;  %v2743_v40 = vpop.f32.mrb[7].mxu1 }
 0x17f   : > { %v755_v41 = vrot.slane %v754_v31, 1  ;;  %v767_v42 = vrot.slane %v766_v32, 2  ;;  %v779_v43 = vrot.slane %v778_v38, 4  ;;  %v771_v44 = vsel %vm728_vm12, %v2743_v40, 0.0  ;;  %2219 = vmatprep.mubr.msk.f32.mxu1 %vm728_vm12, %v2743_v40  ;;  %v912_v24 = vpop.permute.xlu0 %911 }
 0x180   : > { %v794_v46 = vsel %vm793_vm13, %v742_v30, %v735_v35  ;;  %v748_v47 = vrot.slane %v747_v36, 1  ;;  %v760_v48 = vrot.slane %v759_v37, 2  ;;  %v772_v49 = vrot.slane %v771_v44, 4  ;;  %2220 = vmatmul.mubr.msk.f32.gmra.mrb[14].mxu1 %vm728_vm12, %v2739_v34 }
 0x181   : > { %v768_v50 = vadd.f32 %v767_v42, %v766_v32  ;;  %v780_v51 = vadd.f32 %v779_v43, %v778_v38  ;;  %v756_v55 = vadd.f32 %v755_v41, %v754_v31 }
 0x182   : > { %v749_v52 = vadd.f32 %v748_v47, %v747_v36  ;;  %v761_v53 = vadd.f32 %v760_v48, %v759_v37  ;;  %v773_v54 = vadd.f32 %v772_v49, %v771_v44 }
 0x183   : > { %v769_v56 = vrot.slane %v768_v50, 1  ;;  %v781_v57 = vrot.slane %v780_v51, 2 }
 0x184   : > { %v762_v59 = vrot.slane %v761_v53, 1  ;;  %v774_v61 = vrot.slane %v773_v54, 2  ;;  %v796_v62 = vsel %vm795_vm14, %v749_v52, %v794_v46  ;;  %v2804_v46 = vshrl.u32 %v468_v22, 7 }
 0x185   : > { %v782_v63 = vadd.f32 %v781_v57, %v780_v51  ;;  %v798_v0 = vsel %vm797_vm15, %v756_v55, %v796_v62  ;;  %v770_v5 = vadd.f32 %v769_v56, %v768_v50 }
 0x186   : > { %v763_v2 = vadd.f32 %v762_v59, %v761_v53  ;;  %v775_v3 = vadd.f32 %v774_v61, %v773_v54  ;;  %v1095_v54 = vsub.s32 0, %v2804_v46 }
 0x187   : > { %v783_v8 = vrot.slane %v782_v63, 1 }
 0x188   : > { %v776_v9 = vrot.slane %v775_v3, 1  ;;  %v800_v10 = vsel %vm799_vm0, %v763_v2, %v798_v0 }
 0x189   : > { %v802_v11 = vsel %vm801_vm3, %v770_v5, %v800_v10  ;;  %v784_v13 = vadd.f32 %v783_v8, %v782_v63 }
 0x18a   : > { %v777_v12 = vadd.f32 %v776_v9, %v775_v3 }
 0x18c   : > { %v804_v15 = vsel %vm803_vm4, %v777_v12, %v802_v11 }
 0x18d   : > { %v2758_v16 = vsel %vm805_vm5, %v784_v13, %v804_v15 }
 0x18e   : > { %807 = vrot.lane.b32.xlu1 %v2758_v16, %s2486_s14 }
 0x200   : > { %v808_v19 = vpop.permute.xlu1 %807 }
 0x201   : > { %v810_v21 = vsel %vm728_vm12, %v547_v33, %v808_v19 }
 0x202   : > { %2200 = vmatmul.mubr.msk.f32.vlgmr.msra.gmra.mrb[2].mxu0 %vm819_vm6, %v810_v21 }
 0x203   : > { %2230 = vmatprep.mubr.msk.f32.mxu0 %vm2483_vm1, %v2484_v18  ;;  %vm1253_vm1 = vcmask 523520  }
 0x247   : > { %v2212_v25 = vpop.f32.mrb[8].mxu1 }
 0x248   : > { %v1010_v26 = vadd.f32 %v2212_v25, %v912_v24  ;;  %v1004_v27 = vpop.f32.mrb[9].mxu1 }
 0x249   : > { %v1005_v28 = vadd.f32 %v1004_v27, %v912_v24 }
 0x24a   : > { %1143 = vrot.lane.b32.xlu0 %v1010_v26, %s2486_s14 }
 0x24b   : > { %v2215_v29 = vpop.f32.mrb[10].mxu1  ;;  %1141 = vrot.lane.b32.xlu1 %v1005_v28, %s2486_s14 }
 0x24c   : > { %v1020_v30 = vadd.f32 %v2215_v29, %v912_v24  ;;  %v1014_v31 = vpop.f32.mrb[11].mxu1 }
 0x24d   : > { %v1015_v32 = vadd.f32 %v1014_v31, %v912_v24 }
 0x24e   : > { %1147 = vrot.lane.b32.xlu0 %v1020_v30, %s2486_s14 }
 0x24f   : > { %v2218_v33 = vpop.f32.mrb[12].mxu1  ;;  %1145 = vrot.lane.b32.xlu1 %v1015_v32, %s2486_s14 }
 0x250   : > { %v1030_v35 = vadd.f32 %v2218_v33, %v912_v24  ;;  %v1024_v36 = vpop.f32.mrb[13].mxu1 }
 0x251   : > { %v1025_v37 = vadd.f32 %v1024_v36, %v912_v24 }
 0x252   : > { %1151 = vrot.lane.b32.xlu0 %v1030_v35, %s2486_s14 }
 0x253   : > { %v2221_v38 = vpop.f32.mrb[14].mxu1  ;;  %1149 = vrot.lane.b32.xlu1 %v1025_v37, %s2486_s14 }
 0x254   : > { %v1040_v39 = vadd.f32 %v2221_v38, %v912_v24  ;;  %v1034_v41 = vpop.f32.mrb[15].mxu1 }
 0x255   : > { %v1035_v42 = vadd.f32 %v1034_v41, %v912_v24 }
 0x256   : > { %1155 = vrot.lane.b32.xlu0 %v1040_v39, %s2486_s14 }
 0x257   : > { %1153 = vrot.lane.b32.xlu1 %v1035_v42, %s2486_s14 }
 0x25a   : > { %1223 = vrot.lane.b32.xlu0 %v2703_v58, %s2486_s14  ;;  %v1310_v58 = vld [vmem:[%s3006_s9] sm:$0xff] }
 0x25b   : > { %1221 = vrot.lane.b32.xlu1 %v2707_v60, %s2486_s14  ;;  %v1311_v60 = vld [vmem:[%s3006_s9 + $0x8] sm:$0xff] }
 0x25e   : > { %1227 = vrot.lane.b32.xlu0 %v2715_v1, %s2486_s14  ;;  %v1312_v1 = vld [vmem:[%s3006_s9 + $0x10] sm:$0xff] }
 0x25f   : > { %1225 = vrot.lane.b32.xlu1 %v2719_v4, %s2486_s14  ;;  %v2308_v4 = vpack.c.bf16 %v1311_v60, %v1310_v58 }
 0x261   : > { %2309 = vmatpush3.bf16.msra.mxu0 %v2308_v4 }
 0x262   : > { %1231 = vrot.lane.b32.xlu0 %v2727_v14, %s2486_s14  ;;  %v1313_v14 = vld [vmem:[%s3006_s9 + $0x18] sm:$0xff]  ;;  %2310 = vmatprep.subr.bf16.mxu0 %v2482_v17 }
 0x263   : > { %1229 = vrot.lane.b32.xlu1 %v2731_v20, %s2486_s14  ;;  %v2311_v20 = vpack.c.bf16 %v1313_v14, %v1312_v1 }
 0x265   : > { %2312 = vmatpush3.bf16.msra.mxu0 %v2311_v20 }
 0x266   : > { %1235 = vrot.lane.b32.xlu0 %v2739_v34, %s2486_s14  ;;  %v2487_v34 = vmov 1966171168  }
 0x267   : > { %1233 = vrot.lane.b32.xlu1 %v2743_v40, %s2486_s14  ;;  %v1046_v40 = vunpack.c.l.s4 %v2487_v34 }
 0x269   : > { %v1047_v44 = vunpack.c.0.s8 %v1046_v40 }
 0x26b   : > { %v1050_v48 = vsub.s32 %v1047_v44, %v2804_v46 }
 0x2bc   : > { %v1144_v43 = vpop.permute.xlu0 %1143 }
 0x2bd   : > { %v1142_v47 = vpop.permute.xlu1 %1141 }
 0x2c0   : > { %v1148_v49 = vpop.permute.xlu0 %1147 }
 0x2c1   : > { %v1146_v50 = vpop.permute.xlu1 %1145 }
 0x2c4   : > { %v1152_v62 = vpop.permute.xlu0 %1151 }
 0x2c5   : > { %v1150_v63 = vpop.permute.xlu1 %1149 }
 0x2c8   : > { %v1156_v31 = vpop.permute.xlu0 %1155 }
 0x2c9   : > { %v1154_v32 = vpop.permute.xlu1 %1153 }
 0x2cc   : > { %v1224_v20 = vpop.permute.xlu0 %1223 }
 0x2d5   : > { %v2807_v51 = vpop.f32.mrb[2].mxu0 }
 0x2d6   : > { %v1044_v52 = vcombine.high %v2807_v51, %v2807_v51  ;;  %v1051_v17 = vrot.slane %v2807_v51, %v1050_v48  ;;  %v2201_v53 = vpop.f32.mrb[3].mxu0 }
 0x2d8   : > { %v1058_v55 = vrot.slane %v1044_v52, %v1050_v48  ;;  %v1059_v56 = vcombine.high %v1051_v17, %v1051_v17  ;;  %v1067_v57 = vrot.slane %v1051_v17, %v1050_v48 }
 0x2da   : > { %v1060_v22 = vcombine.high %v1058_v55, %v1058_v55  ;;  %v1074_v59 = vrot.slane %v1058_v55, %v1050_v48  ;;  %v1081_v61 = vrot.slane %v1059_v56, %v1050_v48  ;;  %v1089_v0 = vcombine.high %v1067_v57, %v1067_v57 }
 0x2db   : > { %v1096_v2 = vrot.slane %v1067_v57, %v1095_v54 }
 0x2dc   : > { %v1088_v3 = vrot.slane %v1060_v22, %v1050_v48  ;;  %v1090_v5 = vcombine.high %v1074_v59, %v1074_v59  ;;  %v1091_v8 = vcombine.high %v1081_v61, %v1081_v61  ;;  %v1100_v9 = vrot.slane %v1081_v61, %v1095_v54 }
 0x2dd   : > { %v1104_v10 = vrot.slane %v1089_v0, %v1095_v54  ;;  %v1112_v11 = vrot.slane %v1074_v59, %v1095_v54  ;;  %v1165_v12 = vadd.f32 %v1142_v47, %v1096_v2 }
 0x2de   : > { %v1092_v13 = vcombine.high %v1088_v3, %v1088_v3  ;;  %v1108_v15 = vrot.slane %v1091_v8, %v1095_v54  ;;  %v1116_v19 = vrot.slane %v1088_v3, %v1095_v54  ;;  %v1120_v21 = vrot.slane %v1090_v5, %v1095_v54 }
 0x2df   : > { %v1166_v24 = vadd.f32 %v1144_v43, %v1100_v9  ;;  %v1167_v25 = vadd.f32 %v1146_v50, %v1104_v10  ;;  %v2065_v26 = vmul.f32 -1.442695, %v1165_v12  ;;  %v1169_v29 = vadd.f32 %v1150_v63, %v1112_v11  ;;  %v1222_v43 = vpop.permute.xlu1 %1221 }
 0x2e0   : > { %v1124_v27 = vrot.slane %v1092_v13, %v1095_v54  ;;  %v1168_v28 = vadd.f32 %v1148_v49, %v1108_v15  ;;  %v1170_v30 = vadd.f32 %v1152_v62, %v1116_v19  ;;  %v1171_v39 = vadd.f32 %v1154_v32, %v1120_v21  ;;  %v1228_v54 = vpop.permute.xlu0 %1227 }
 0x2e1   : > { %2372 = vpow2.f32 %v2065_v26  ;;  %v2066_v33 = vmul.f32 -1.442695, %v1166_v24  ;;  %v2067_v35 = vmul.f32 -1.442695, %v1167_v25  ;;  %v2069_v41 = vmul.f32 -1.442695, %v1169_v29 }
 0x2e2   : > { %v2068_v36 = vmul.f32 -1.442695, %v1168_v28  ;;  %v2070_v37 = vmul.f32 -1.442695, %v1170_v30  ;;  %v1172_v38 = vadd.f32 %v1156_v31, %v1124_v27  ;;  %v2071_v58 = vmul.f32 -1.442695, %v1171_v39 }
 0x2e3   : > { %2374 = vpow2.f32 %v2066_v33  ;;  %v1226_v56 = vpop.permute.xlu1 %1225 }
 0x2e4   : > { %2376 = vpow2.f32 %v2067_v35  ;;  %v2072_v42 = vmul.f32 -1.442695, %v1172_v38  ;;  %v1232_v62 = vpop.permute.xlu0 %1231 }
 0x2e5   : > { %2378 = vpow2.f32 %v2068_v36 }
 0x2e6   : > { %2380 = vpow2.f32 %v2070_v37 }
 0x2e7   : > { %2382 = vpow2.f32 %v2069_v41  ;;  %v1230_v0 = vpop.permute.xlu1 %1229 }
 0x2e8   : > { %2384 = vpow2.f32 %v2072_v42  ;;  %v1236_v29 = vpop.permute.xlu0 %1235 }
 0x2e9   : > { %2386 = vpow2.f32 %v2071_v58 }
 0x2eb   : > { %v2373_v60 = vpop.eup %2372  ;;  %v1234_v36 = vpop.permute.xlu1 %1233 }
 0x2ec   : > { %v1197_v1 = vadd.f32 1.0, %v2373_v60 }
 0x2ed   : > { %v2375_v4 = vpop.eup %2374 }
 0x2ee   : > { %v2377_v14 = vpop.eup %2376  ;;  %v1198_v34 = vadd.f32 1.0, %v2375_v4  ;;  %2388 = vrcp.f32 %v1197_v1 }
 0x2ef   : > { %v2379_v40 = vpop.eup %2378  ;;  %v1199_v44 = vadd.f32 1.0, %v2377_v14 }
 0x2f0   : > { %v2381_v47 = vpop.eup %2380  ;;  %v1200_v48 = vadd.f32 1.0, %v2379_v40  ;;  %2390 = vrcp.f32 %v1198_v34 }
 0x2f1   : > { %v1202_v49 = vadd.f32 1.0, %v2381_v47  ;;  %2392 = vrcp.f32 %v1199_v44  ;;  %v2383_v50 = vpop.eup %2382 }
 0x2f2   : > { %2394 = vrcp.f32 %v1200_v48  ;;  %v2385_v52 = vpop.eup %2384  ;;  %v1201_v17 = vadd.f32 1.0, %v2383_v50 }
 0x2f3   : > { %2396 = vrcp.f32 %v1202_v49  ;;  %v2387_v53 = vpop.eup %2386  ;;  %v1204_v55 = vadd.f32 1.0, %v2385_v52 }
 0x2f4   : > { %2398 = vrcp.f32 %v1201_v17  ;;  %v1203_v57 = vadd.f32 1.0, %v2387_v53 }
 0x2f5   : > { %2400 = vrcp.f32 %v1204_v55 }
 0x2f6   : > { %2402 = vrcp.f32 %v1203_v57 }
 0x2f8   : > { %v2389_v22 = vpop.eup %2388 }
 0x2f9   : > { %v1245_v59 = vmul.f32 %v2389_v22, %v1222_v43 }
 0x2fa   : > { %v2391_v61 = vpop.eup %2390 }
 0x2fb   : > { %v2393_v63 = vpop.eup %2392  ;;  %v1246_v2 = vmul.f32 %v2391_v61, %v1224_v20  ;;  %v1254_v3 = vsel %vm1253_vm1, %v1245_v59, 0.0 }
 0x2fc   : > { %v2395_v5 = vpop.eup %2394  ;;  %v1247_v8 = vmul.f32 %v2393_v63, %v1226_v56  ;;  %v1255_v9 = vrot.slane %v1254_v3, 4 }
 0x2fd   : > { %v2397_v10 = vpop.eup %2396  ;;  %v1248_v11 = vmul.f32 %v2395_v5, %v1228_v54  ;;  %v1261_v12 = vsel %vm1253_vm1, %v1246_v2, 0.0 }
 0x2fe   : > { %v1250_v13 = vmul.f32 %v2397_v10, %v1232_v62  ;;  %v1256_v15 = vadd.f32 %v1255_v9, %v1254_v3  ;;  %v1262_v19 = vrot.slane %v1261_v12, 4  ;;  %v1268_v21 = vsel %vm1253_vm1, %v1247_v8, 0.0  ;;  %v2399_v24 = vpop.eup %2398 }
 0x2ff   : > { %v1269_v25 = vrot.slane %v1268_v21, 4  ;;  %v1275_v26 = vsel %vm1253_vm1, %v1248_v11, 0.0  ;;  %v2401_v27 = vpop.eup %2400  ;;  %v1249_v28 = vmul.f32 %v2399_v24, %v1230_v0 }
 0x300   : > { %v1257_v30 = vrot.slane %v1256_v15, 2  ;;  %v1263_v31 = vadd.f32 %v1262_v19, %v1261_v12  ;;  %v1276_v32 = vrot.slane %v1275_v26, 4  ;;  %v2403_v33 = vpop.eup %2402  ;;  %v1252_v35 = vmul.f32 %v2401_v27, %v1236_v29 }
 0x301   : > { %v1270_v37 = vadd.f32 %v1269_v25, %v1268_v21  ;;  %v1289_v38 = vsel %vm1253_vm1, %v1250_v13, 0.0  ;;  %v1282_v39 = vsel %vm1253_vm1, %v1249_v28, 0.0  ;;  %v1251_v41 = vmul.f32 %v2403_v33, %v1234_v36 }
 0x302   : > { %v1258_v42 = vadd.f32 %v1257_v30, %v1256_v15  ;;  %v1264_v58 = vrot.slane %v1263_v31, 2  ;;  %v1283_v60 = vrot.slane %v1282_v39, 4  ;;  %v1303_v1 = vsel %vm1253_vm1, %v1252_v35, 0.0 }
 0x303   : > { %v1271_v4 = vrot.slane %v1270_v37, 2  ;;  %v1277_v14 = vadd.f32 %v1276_v32, %v1275_v26  ;;  %v1304_v20 = vrot.slane %v1303_v1, 4  ;;  %v1296_v34 = vsel %vm1253_vm1, %v1251_v41, 0.0  ;;  %v2074_v41 = vld [vmem:[%s456_s21] ss:$0 sm:$0xff] }
 0x304   : > { %v1259_v40 = vrot.slane %v1258_v42, 1  ;;  %v1265_v43 = vadd.f32 %v1264_v58, %v1263_v31  ;;  %v1284_v44 = vadd.f32 %v1283_v60, %v1282_v39  ;;  %v1297_v47 = vrot.slane %v1296_v34, 4 }
 0x305   : > { %v1272_v48 = vadd.f32 %v1271_v4, %v1270_v37  ;;  %v1278_v49 = vrot.slane %v1277_v14, 2  ;;  %v1305_v50 = vadd.f32 %v1304_v20, %v1303_v1  ;;  %v1290_v17 = vrot.slane %v1289_v38, 4 }
 0x306   : > { %v1266_v52 = vrot.slane %v1265_v43, 1  ;;  %v1285_v53 = vrot.slane %v1284_v44, 2  ;;  %v1298_v54 = vadd.f32 %v1297_v47, %v1296_v34  ;;  %v1260_v22 = vadd.f32 %v1259_v40, %v1258_v42 }
 0x307   : > { %v1273_v55 = vrot.slane %v1272_v48, 1  ;;  %v1279_v56 = vadd.f32 %v1278_v49, %v1277_v14  ;;  %v1306_v57 = vrot.slane %v1305_v50, 2  ;;  %v1291_v61 = vadd.f32 %v1290_v17, %v1289_v38 }
 0x308   : > { %v1267_v59 = vadd.f32 %v1266_v52, %v1265_v43  ;;  %v1286_v62 = vadd.f32 %v1285_v53, %v1284_v44  ;;  %v1299_v63 = vrot.slane %v1298_v54, 2  ;;  %vm1427_vm7 = vcmp.eq.s32.totalorder %v2804_v46, %v2074_v41 }
 0x309   : > { %v1274_v0 = vadd.f32 %v1273_v55, %v1272_v48  ;;  %v1280_v2 = vrot.slane %v1279_v56, 1  ;;  %v1307_v3 = vadd.f32 %v1306_v57, %v1305_v50  ;;  %v1292_v5 = vrot.slane %v1291_v61, 2  ;;  %v1609_v55 = vld [vmem:[%s3001_s4 + $0x28] sm:$0xff] (!%p2077_p5)  ;;  %v1611_v57 = vld [vmem:[%s3001_s4 + $0x38] sm:$0xff] (!%p2077_p5) }
 0x30a   : > { %v1322_v8 = vsel %vm793_vm13, %v1267_v59, %v1260_v22  ;;  %v1287_v9 = vrot.slane %v1286_v62, 1  ;;  %v1300_v10 = vadd.f32 %v1299_v63, %v1298_v54  ;;  %v1429_v42 = vsel %vm1427_vm7, 1.0, %v2484_v18  ;;  %v1610_v22 = vld [vmem:[%s3001_s4 + $0x30] sm:$0xff] (!%p2077_p5)  ;;  %v1529_v59 = vld [vmem:[%s3002_s5] sm:$0xff] (!%p2077_p5) }
 0x30b   : > { %v1281_v11 = vadd.f32 %v1280_v2, %v1279_v56  ;;  %v1323_v12 = vsel %vm795_vm14, %v1274_v0, %v1322_v8  ;;  %v1293_v13 = vadd.f32 %v1292_v5, %v1291_v61  ;;  %v1308_v24 = vrot.slane %v1307_v3, 1  ;;  %v1608_v56 = vld [vmem:[%s3001_s4 + $0x20] sm:$0xff] (!%p2077_p5)  ;;  %v1530_v61 = vld [vmem:[%s3002_s5 + $0x8] sm:$0xff] (!%p2077_p5) }
 0x30c   : > { %v1288_v15 = vadd.f32 %v1287_v9, %v1286_v62  ;;  %v1301_v19 = vrot.slane %v1300_v10, 1  ;;  %v900_v60 = vadd.f32 %v2671_v45, %v2807_v51  ;;  %v1422_v40 = vadd.s32 8, %v2804_v46  ;;  %v1523_v62 = vld [vmem:[%s3000_s3] sm:$0xff] (!%p2077_p5) }
 0x30d   : > { %v1324_v21 = vsel %vm797_vm15, %v1281_v11, %v1323_v12  ;;  %v1294_v25 = vrot.slane %v1293_v13, 1  ;;  %v1309_v29 = vadd.f32 %v1308_v24, %v1307_v3  ;;  %v2489_v46 = vmov (!%p2077_p5), 0  }
 0x30e   : > { %v1325_v26 = vsel %vm799_vm0, %v1288_v15, %v1324_v21  ;;  %v1302_v28 = vadd.f32 %v1301_v19, %v1300_v10  ;;  %v2056_v1 = vmul.f32 -1.442695, %v900_v60  ;;  %vm1428_vm9 = vcmp.eq.s32.totalorder %v1422_v40, %v2074_v41  ;;  %2411 = vset.pattern.permute.xlu1 (!%p2077_p5), %v2489_v46  ;;  %2410 = vset.pattern.permute.xlu0 (!%p2077_p5), %v2489_v46  ;;  %v1862_v41 = vld [vmem:[%s3007_s10 + $0x30] sm:$0xff] (!%p2077_p5) }
 0x30f   : > { %v1295_v27 = vadd.f32 %v1294_v25, %v1293_v13  ;;  %v1430_v49 = vsel %vm1428_vm9, 1.0, %v2484_v18  ;;  %v1606_v18 = vld [vmem:[%s3001_s4 + $0x10] sm:$0xff] (!%p2077_p5)  ;;  %v2314_v63 = vpack.c.bf16 (!%p2077_p5), %v1530_v61, %v1529_v59  ;;  %v2490_v0 = vmov (!%p2077_p5), 0.0|0.0  }
 0x310   : > { %v2492_v2 = vmov (!%p2077_p5), 0.0  }
 0x311   : > { %v1326_v30 = vsel %vm801_vm3, %v1295_v27, %v1325_v26 }
 0x312   : > { %v1327_v31 = vsel %vm803_vm4, %v1302_v28, %v1326_v30 }
 0x313   : > { %v1328_v32 = vsel %vm805_vm5, %v1309_v29, %v1327_v31  ;;  %v1856_v31 = vld [vmem:[%s3007_s10] sm:$0xff] (!%p2077_p5) }
 0x314   : > { %1329 = vrot.lane.b32.xlu1 %v1328_v32, %s2485_s30  ;;  %v1857_v32 = vld [vmem:[%s3007_s10 + $0x8] sm:$0xff] (!%p2077_p5) }
 0x386   : > { %v1330_v33 = vpop.permute.xlu1 %1329 }
 0x387   : > { %2231 = vmatmul.mubr.msk.f32.vlgmr.msra.gmra.mrb[4].mxu0 %vm728_vm12, %v1330_v33  ;;  %v2321_v33 = vpack.c.bf16 (!%p2077_p5), %v1857_v32, %v1856_v31 }
 0x388   : > { %2235 = vmatprep.mubr.msk.f32.mxu0 %vm1431_vm8, %v1429_v42  ;;  %v1863_v42 = vld [vmem:[%s3007_s10 + $0x38] sm:$0xff] (!%p2077_p5) }
 0x45a   : > { %v1399_v35 = vpop.f32.mrb[4].mxu0 }
 0x45b   : > { %1404 = vrot.lane.b32.xlu0 %v1399_v35, %s2488_s24  ;;  %v2232_v36 = vpop.f32.mrb[5].mxu0  ;;  %v1859_v35 = vld [vmem:[%s3007_s10 + $0x18] sm:$0xff] (!%p2077_p5) }
 0x4cd   : > { %v1405_v37 = vpop.permute.xlu0 %1404 }
 0x4ce   : > { %v1407_v38 = vadd.f32 %v1405_v37, %v2807_v51  ;;  %v1860_v37 = vld [vmem:[%s3007_s10 + $0x20] sm:$0xff] (!%p2077_p5) }
 0x4d0   : > { %v1408_v39 = vadd.f32 %v2671_v45, %v1407_v38  ;;  %v1861_v38 = vld [vmem:[%s3007_s10 + $0x28] sm:$0xff] (!%p2077_p5) }
 0x4d2   : > { %2404 = vtanh.f32 %v1408_v39  ;;  %v2327_v39 = vpack.c.bf16 (!%p2077_p5), %v1861_v38, %v1860_v37 }
 0x4d3   : > { %2406 = vpow2.f32 %v2056_v1 }
 0x4dc   : > { %v2405_v58 = vpop.eup %2404 }
 0x4dd   : > { %1414 = vrot.lane.b32.xlu1 %v2405_v58, %s2488_s24  ;;  %v2407_v4 = vpop.eup %2406  ;;  %v2330_v58 = vpack.c.bf16 (!%p2077_p5), %v1863_v42, %v1862_v41 }
 0x4de   : > { %v904_v14 = vadd.f32 1.0, %v2407_v4 }
 0x4e0   : > { %2408 = vrcp.f32 %v904_v14 }
 0x4e1   : > { %1619 = vperm.xlu1 (!%p2077_p5), %2411, %v1606_v18  }
 0x4ea   : > { %v2409_v20 = vpop.eup %2408 }
 0x4eb   : > { %v1410_v34 = vsub.f32 1.0, %v2409_v20 }
 0x4ed   : > { %v1412_v44 = vmul.f32 %v1410_v34, %v2758_v16  ;;  %v1604_v16 = vld [vmem:[%s3001_s4] sm:$0xff] (!%p2077_p5) }
 0x4ee   : > { %1613 = vperm.xlu0 (!%p2077_p5), %2410, %v1604_v16  }
 0x54f   : > { %v1415_v43 = vpop.permute.xlu1 %1414 }
 0x550   : > { %v1417_v47 = vmul.f32 %v2409_v20, %v1415_v43 }
 0x552   : > { %v1418_v48 = vadd.f32 %v1417_v47, %v1412_v44 }
 0x554   : > { %2233 = vmatprep.subr.mxu0 %v1418_v48 }
 0x555   : > { %2234 = vmatpush3.msra.mxu0 %v1418_v48 }
 0x556   : > { %2236 = vmatmul.mubr.msk.f32.vlgmr.msra.gmra.mrb[6].mxu0 %vm1431_vm8, %v1430_v49  ;;  %2313 = vmatprep.subr.bf16.mxu0 (!%p2077_p5), %v2490_v0 }
 0x557   : > { %2315 = vmatpush3.bf16.msra.mxu0 (!%p2077_p5), %v2314_v63  ;;  %2242 = vmatprep.mubr.msk.f32.mxu0 (!%p2077_p5), %vm2491_vm10, %v2492_v2 }
 0x558   : > { %2320 = vmatprep.subr.bf16.mxu0 (!%p2077_p5), %v2490_v0 }
 0x560   : > { %v1620_v3 = vpop.permute.xlu1 (!%p2077_p5), %1619 }
 0x561   : > { %vm1638_vm1 = vcmp.eq.s32.totalorder (!%p2077_p5), %v2631_v23, %v1620_v3 }
 0x562   : > { %v1646_v11 = vsel (!%p2077_p5), %vm1638_vm1, 1.0, %v2492_v2 }
 0x56d   : > { %v1614_v5 = vpop.permute.xlu0 (!%p2077_p5), %1613 }
 0x56e   : > { %vm1636_vm11 = vcmp.eq.s32.totalorder (!%p2077_p5), %v2631_v23, %v1614_v5 }
 0x56f   : > { %v1644_v8 = vsel (!%p2077_p5), %vm1636_vm11, 1.0, %v2492_v2 }
 0x570   : > { %2249 = vmatprep.mubr.msk.f32.mxu1 (!%p2077_p5), %vm477_vm2, %v1644_v8 }
 0x627   : > { %1520 = sbr.rel (%p2077_p5) target bundleno = 2282 (0x8ea), region = 76 }
 0x629   : > { %v2237_v45 = vpop.f32.mrb[6].mxu0 }
 0x62a   : > { %v1514_v51 = vadd.f32 %v2237_v45, %v2605_v7  ;;  %v1504_v50 = vpop.f32.mrb[7].mxu0  ;;  %v1605_v7 = vld [vmem:[%s3001_s4 + $0x8] sm:$0xff] (!%p2077_p5) }
 0x62b   : > { %v1513_v52 = vadd.f32 %v1504_v50, %v2603_v6  ;;  %v1607_v6 = vld [vmem:[%s3001_s4 + $0x18] sm:$0xff] (!%p2077_p5)  ;;  %1616 = vperm.xlu0 (!%p2077_p5), %2410, %v1605_v7  }
 0x62c   : > { %1516 = vst.msk [vmem:[#allocation2 + $0x8] sm:$0xff] %vm728_vm12, %v1514_v51  ;;  %1622 = vperm.xlu1 (!%p2077_p5), %2411, %v1607_v6  }
 0x62d   : > { %1515 = vst.msk [vmem:[#allocation2] sm:$0xff] %vm728_vm12, %v1513_v52 }
 0x62f   : > { %1625 = vperm.xlu0 %2410, %v1608_v56  }
 0x630   : > { %1628 = vperm.xlu1 %2411, %v1609_v55  }
 0x633   : > { %v1522_v53 = vld [vmem:[#allocation2 + $0x8] sm:$0xff]  ;;  %1631 = vperm.xlu0 %2410, %v1610_v22  }
 0x634   : > { %v1521_v17 = vld [vmem:[#allocation2] sm:$0xff]  ;;  %1634 = vperm.xlu1 %2411, %v1611_v57  }
 0x635   : > { %v2316_v54 = vpack.c.bf16 %v1522_v53, %v1521_v17 }
 0x637   : > { %2317 = vmatprep.subr.bf16.mxu1 %v2316_v54  ;;  %1525 = vperm.xlu0 %2410, %v1523_v62  }
 0x638   : > { %2319 = vmatpush3.bf16.msra.mxu1 %v2316_v54 }
 0x6aa   : > { %v1617_v10 = vpop.permute.xlu0 %1616 }
 0x6ab   : > { %v1623_v9 = vpop.permute.xlu1 %1622  ;;  %vm1637_vm7 = vcmp.eq.s32.totalorder %v2631_v23, %v1617_v10 }
 0x6ac   : > { %v1645_v12 = vsel %vm1637_vm7, 1.0, %v2492_v2  ;;  %vm1639_vm8 = vcmp.eq.s32.totalorder %v2631_v23, %v1623_v9 }
 0x6ad   : > { %2250 = vmatmul.mubr.msk.f32.vlgmr.msra.gmra.mrb[0].mxu1 %vm477_vm2, %v1645_v12  ;;  %v1647_v19 = vsel %vm1639_vm8, 1.0, %v2492_v2 }
 0x6ae   : > { %v1626_v15 = vpop.permute.xlu0 %1625  ;;  %2252 = vmatprep.mubr.msk.f32.mxu1 %vm477_vm2, %v1646_v11 }
 0x6af   : > { %v1629_v13 = vpop.permute.xlu1 %1628  ;;  %vm1640_vm9 = vcmp.eq.s32.totalorder %v2631_v23, %v1626_v15 }
 0x6b0   : > { %v1648_v21 = vsel %vm1640_vm9, 1.0, %v2492_v2  ;;  %vm1641_vm11 = vcmp.eq.s32.totalorder %v2631_v23, %v1629_v13 }
 0x6b1   : > { %2253 = vmatmul.mubr.msk.f32.gmra.mrb[2].mxu1 %vm477_vm2, %v1647_v19  ;;  %v1649_v26 = vsel %vm1641_vm11, 1.0, %v2492_v2 }
 0x6b2   : > { %v1632_v25 = vpop.permute.xlu0 %1631  ;;  %2255 = vmatprep.mubr.msk.f32.mxu1 %vm477_vm2, %v1648_v21 }
 0x6b3   : > { %v1635_v24 = vpop.permute.xlu1 %1634  ;;  %vm1642_vm1 = vcmp.eq.s32.totalorder %v2631_v23, %v1632_v25 }
 0x6b4   : > { %v1650_v27 = vsel %vm1642_vm1, 1.0, %v2492_v2  ;;  %vm1643_vm7 = vcmp.eq.s32.totalorder %v2631_v23, %v1635_v24 }
 0x6b5   : > { %2256 = vmatmul.mubr.msk.f32.gmra.mrb[4].mxu1 %vm477_vm2, %v1649_v26  ;;  %v1651_v29 = vsel %vm1643_vm7, 1.0, %v2492_v2 }
 0x6b6   : > { %v1526_v28 = vpop.permute.xlu0 %1525  ;;  %2258 = vmatprep.mubr.msk.f32.mxu1 %vm477_vm2, %v1650_v27 }
 0x6b7   : > { %vm1527_vm8 = vcmp.eq.s32.totalorder %v2631_v23, %v1526_v28  ;;  %v1858_v23 = vld [vmem:[%s3007_s10 + $0x10] sm:$0xff] }
 0x6b8   : > { %v1528_v30 = vsel %vm1527_vm8, 1.0, %v2492_v2  ;;  %v2324_v36 = vpack.c.bf16 %v1859_v35, %v1858_v23 }
 0x6b9   : > { %2243 = vmatmul.mubr.msk.f32.vlgmr.msra.gmra.mrb[0].mxu0 %vm477_vm2, %v1528_v30  ;;  %2259 = vmatmul.mubr.msk.f32.gmra.mrb[6].mxu1 %vm477_vm2, %v1651_v29 }
 0x6ba   : > { %2277 = vmatprep.mubr.msk.f32.mxu0 %vm2491_vm10, %v2492_v2  ;;  %2322 = vmatpush3.bf16.msra.mxu0 %v2321_v33 }
 0x6bb   : > { %2323 = vmatprep.subr.bf16.mxu0 %v2490_v0 }
 0x6be   : > { %2325 = vmatpush3.bf16.msra.mxu0 %v2324_v36 }
 0x6bf   : > { %2326 = vmatprep.subr.bf16.mxu0 %v2490_v0 }
 0x6c2   : > { %2328 = vmatpush3.bf16.msra.mxu0 %v2327_v39 }
 0x6c3   : > { %2329 = vmatprep.subr.bf16.mxu0 %v2490_v0 }
 0x6c6   : > { %2331 = vmatpush3.bf16.msra.mxu0 %v2330_v58 }
 0x780   : > { %v2251_v60 = vpop.f32.mrb[0].mxu1 }
 0x781   : > { %v1788_v1 = vsel %vm728_vm12, %v2251_v60, 0.0  ;;  %v1742_v4 = vpop.f32.mrb[1].mxu1 }
 0x782   : > { %v1789_v14 = vrot.slane %v1788_v1, 4  ;;  %v1781_v20 = vsel %vm728_vm12, %v1742_v4, 0.0 }
 0x783   : > { %v1782_v34 = vrot.slane %v1781_v20, 4 }
 0x784   : > { %v1790_v40 = vadd.f32 %v1789_v14, %v1788_v1  ;;  %v2254_v43 = vpop.f32.mrb[2].mxu1 }
 0x785   : > { %v1783_v44 = vadd.f32 %v1782_v34, %v1781_v20  ;;  %v1802_v47 = vsel %vm728_vm12, %v2254_v43, 0.0  ;;  %v1752_v48 = vpop.f32.mrb[3].mxu1 }
 0x786   : > { %v1791_v49 = vrot.slane %v1790_v40, 2  ;;  %v1803_v45 = vrot.slane %v1802_v47, 4  ;;  %v1795_v51 = vsel %vm728_vm12, %v1752_v48, 0.0 }
 0x787   : > { %v1784_v50 = vrot.slane %v1783_v44, 2  ;;  %v1796_v52 = vrot.slane %v1795_v51, 4 }
 0x788   : > { %v1792_v18 = vadd.f32 %v1791_v49, %v1790_v40  ;;  %v1804_v16 = vadd.f32 %v1803_v45, %v1802_v47  ;;  %v2257_v46 = vpop.f32.mrb[4].mxu1  ;;  %v2087_v49 = vld [vmem:[%s3008_s11] ss:$0 sm:$0xff] }
 0x789   : > { %v1785_v6 = vadd.f32 %v1784_v50, %v1783_v44  ;;  %v1797_v7 = vadd.f32 %v1796_v52, %v1795_v51  ;;  %v1816_v17 = vsel %vm728_vm12, %v2257_v46, 0.0  ;;  %v1762_v53 = vpop.f32.mrb[5].mxu1 }
 0x78a   : > { %v1793_v54 = vrot.slane %v1792_v18, 1  ;;  %v1805_v55 = vrot.slane %v1804_v16, 2  ;;  %v1817_v56 = vrot.slane %v1816_v17, 4  ;;  %v1809_v57 = vsel %vm728_vm12, %v1762_v53, 0.0 }
 0x78b   : > { %v1786_v22 = vrot.slane %v1785_v6, 1  ;;  %v1798_v59 = vrot.slane %v1797_v7, 2  ;;  %v1810_v61 = vrot.slane %v1809_v57, 4 }
 0x78c   : > { %v1794_v62 = vadd.f32 %v1793_v54, %v1792_v18  ;;  %v1806_v63 = vadd.f32 %v1805_v55, %v1804_v16  ;;  %v1818_v0 = vadd.f32 %v1817_v56, %v1816_v17  ;;  %v1600_v2 = vpop.f32.mrb[0].mxu0  ;;  %v2260_v3 = vpop.f32.mrb[6].mxu1 }
 0x78d   : > { %v1787_v5 = vadd.f32 %v1786_v22, %v1785_v6  ;;  %v1799_v8 = vadd.f32 %v1798_v59, %v1797_v7  ;;  %v1811_v9 = vadd.f32 %v1810_v61, %v1809_v57  ;;  %v1830_v10 = vsel %vm728_vm12, %v2260_v3, 0.0  ;;  %v2244_v11 = vpop.f32.mrb[1].mxu0  ;;  %v1772_v12 = vpop.f32.mrb[7].mxu1 }
 0x78e   : > { %v1807_v13 = vrot.slane %v1806_v63, 1  ;;  %v1819_v15 = vrot.slane %v1818_v0, 2  ;;  %v1831_v19 = vrot.slane %v1830_v10, 4  ;;  %v1823_v21 = vsel %vm728_vm12, %v1772_v12, 0.0 }
 0x78f   : > { %v1845_v24 = vsel %vm793_vm13, %v1794_v62, %v1787_v5  ;;  %v1800_v25 = vrot.slane %v1799_v8, 1  ;;  %v1812_v26 = vrot.slane %v1811_v9, 2  ;;  %v1824_v27 = vrot.slane %v1823_v21, 4 }
 0x790   : > { %v1820_v28 = vadd.f32 %v1819_v15, %v1818_v0  ;;  %v1832_v29 = vadd.f32 %v1831_v19, %v1830_v10  ;;  %v1808_v23 = vadd.f32 %v1807_v13, %v1806_v63 }
 0x791   : > { %v1801_v30 = vadd.f32 %v1800_v25, %v1799_v8  ;;  %v1813_v31 = vadd.f32 %v1812_v26, %v1811_v9  ;;  %v1825_v32 = vadd.f32 %v1824_v27, %v1823_v21 }
 0x792   : > { %v1821_v33 = vrot.slane %v1820_v28, 1  ;;  %v1833_v35 = vrot.slane %v1832_v29, 2 }
 0x793   : > { %v1814_v36 = vrot.slane %v1813_v31, 1  ;;  %v1826_v37 = vrot.slane %v1825_v32, 2  ;;  %v1846_v38 = vsel %vm795_vm14, %v1801_v30, %v1845_v24 }
 0x794   : > { %v1834_v39 = vadd.f32 %v1833_v35, %v1832_v29  ;;  %v1847_v41 = vsel %vm797_vm15, %v1808_v23, %v1846_v38  ;;  %v1822_v60 = vadd.f32 %v1821_v33, %v1820_v28 }
 0x795   : > { %v1815_v42 = vadd.f32 %v1814_v36, %v1813_v31  ;;  %v1827_v58 = vadd.f32 %v1826_v37, %v1825_v32 }
 0x796   : > { %v1835_v1 = vrot.slane %v1834_v39, 1 }
 0x797   : > { %v1828_v4 = vrot.slane %v1827_v58, 1  ;;  %v1848_v14 = vsel %vm799_vm0, %v1815_v42, %v1847_v41 }
 0x798   : > { %v1849_v20 = vsel %vm801_vm3, %v1822_v60, %v1848_v14  ;;  %v1836_v40 = vadd.f32 %v1835_v1, %v1834_v39 }
 0x799   : > { %v1829_v34 = vadd.f32 %v1828_v4, %v1827_v58 }
 0x79b   : > { %v1850_v43 = vsel %vm803_vm4, %v1829_v34, %v1849_v20 }
 0x79c   : > { %v1851_v44 = vsel %vm805_vm5, %v1836_v40, %v1850_v43 }
 0x79d   : > { %1852 = vrot.lane.b32.xlu1 %v1851_v44, %s2493_s19 }
 0x80f   : > { %v1853_v47 = vpop.permute.xlu1 %1852 }
 0x810   : > { %v1855_v48 = vsel %vm728_vm12, %v1600_v2, %v1853_v47 }
 0x811   : > { %2278 = vmatmul.mubr.msk.f32.vlgmr.msra.gmra.mrb[2].mxu0 %vm819_vm6, %v1855_v48 }
 0x8e4   : > { %v1940_v45 = vpop.f32.mrb[2].mxu0 }
 0x8e5   : > { %v1941_v51 = vadd.f32 %v2087_v49, %v1940_v45  ;;  %v2279_v50 = vpop.f32.mrb[3].mxu0 }
 0x8e7   : > { %v1944_v52 = vmax.f32 %v1941_v51, 0.0 }
 0x8e9   : > { %1945 = vst.msk [vmem:[#allocation4] sm:$0xff] %vm728_vm12, %v1944_v52 }
 0x8ea PF: > { %p2340_p6 = scmp.eq.s32.totalorder %s2574_s26, 3  ;;  %s2494_s23 = smov [#allocation2]  }
 0x8eb   : > { %s1952_s24 = sshll.u32 %s2494_s23, 4  ;;  %s1953_s24 = int_to_ptr.vmem [resolvable:$true] %s1952_s24 }
 0x8ec   : > { %s2412_s28 = scalar_lea.vmem %s1953_s24, 256  ;;  %p2419_p10 = scmp.lt.s32.totalorder %s1953_s24, %s1953_s24 }
 0x8ed   : > { %p2413_p7 = scmp.ne.s32.totalorder %s1953_s24, %s2412_s28  ;;  %p2420_p11 = scmp.lt.s32.totalorder %s2412_s28, %s2412_s28 }
 0x8ef   : > { %p2414_p8 = pnand %p2413_p7, %p2340_p6  ;;  %p2421_p12 = por %p2420_p11, %p2419_p10 }
 0x8f1   : > { %p2415_p9 = pneg %p2414_p8 }
 0x8f3   : > { %p2422_p13 = pnand %p2421_p12, %p2415_p9 }
 0x8f5   : > { %2425 = shalt.err (!%p2422_p13)
}
 0x8f6   : > { %s2426_s21 = scalar_lea.hbm %s3009_s12, 256 }
 0x8f7   : > { %p2427_p0 = scmp.ne.s32.totalorder %s3009_s12, %s2426_s21  ;;  %p2432_p3 = scmp.lt.u32.totalorder %s2426_s21, %s3009_s12 }
 0x8f9   : > { %p2428_p1 = pnand %p2427_p0, %p2340_p6 }
 0x8fb   : > { %p2429_p2 = pneg %p2428_p1 }
 0x8fd   : > { %p2434_p4 = pnand %p2432_p3, %p2429_p2 }
 0x8ff   : > { %2437 = shalt.err (!%p2434_p4)
}
 0x900   : > { %s2495_s17 = smov 128   ;;  %s2496_s18 = smov 8  }
 0x901   : > { %2333 = dma.vmem_to_hbm [thread:$0]  (%p2340_p6), %s1953_s24, 256, %s3009_s12, [#allocation3], %s2495_s17, %s2495_s17, %s2496_s18  }
 0x902   : > { %s2497_s22 = smov [#allocation4]  }
 0x903   : > { %s1966_s23 = sshll.u32 %s2497_s22, 4  ;;  %s1967_s23 = int_to_ptr.vmem [resolvable:$true] %s1966_s23 }
 0x904   : > { %s2438_s28 = scalar_lea.vmem %s1967_s23, 128  ;;  %p2445_p9 = scmp.lt.s32.totalorder %s1967_s23, %s1967_s23 }
 0x905   : > { %p2439_p5 = scmp.ne.s32.totalorder %s1967_s23, %s2438_s28  ;;  %p2446_p10 = scmp.lt.s32.totalorder %s2438_s28, %s2438_s28 }
 0x907   : > { %p2440_p7 = pnand %p2439_p5, %p2340_p6  ;;  %p2447_p11 = por %p2446_p10, %p2445_p9 }
 0x909   : > { %p2441_p8 = pneg %p2440_p7 }
 0x90b   : > { %p2448_p12 = pnand %p2447_p11, %p2441_p8 }
 0x90d   : > { %2451 = shalt.err (!%p2448_p12)
}
 0x90e   : > { %s2452_s21 = scalar_lea.hbm %s3010_s13, 128 }
 0x90f   : > { %p2453_p13 = scmp.ne.s32.totalorder %s3010_s13, %s2452_s21  ;;  %p2458_p2 = scmp.lt.u32.totalorder %s2452_s21, %s3010_s13 }
 0x911   : > { %p2454_p0 = pnand %p2453_p13, %p2340_p6 }
 0x913   : > { %p2455_p1 = pneg %p2454_p0 }
 0x915   : > { %p2460_p3 = pnand %p2458_p2, %p2455_p1 }
 0x917   : > { %2463 = shalt.err (!%p2460_p3)
}
 0x918   : > { %2335 = dma.vmem_to_hbm [thread:$0]  (%p2340_p6), %s1967_s23, 128, %s3010_s13, [#allocation5]  }
 0x919   : > { %2469 = dma.done.wait (%p2340_p6), [#allocation3], 256  }
 0x91a   : > { %2471 = vsyncadd (%p2340_p6), [#allocation3], 4294967040 }
 0x91b   : > { %2473 = dma.done.wait (%p2340_p6), [#allocation5], 128  }
 0x91c   : > { %2475 = vsyncadd (%p2340_p6), [#allocation5], 4294967168 }
 0x91d PF: > { %s26_s25 = sadd.s32 1, %s2478_s25  }
 0x91e   : > { %p23_p4 = scmp.ge.s32.totalorder %s26_s25, 6  }
 0x920   :  { %25 = sbr.rel (!%p23_p4) target bundleno = 2 (0x2), region = 117 }
 0x927   :  { %1983 = vsyncpa [#allocation3], 1 }
 0x928   :  { %1985 = vsyncpa [#allocation3 + $0x1], 1 }
 0x929   :  { %1986 = vsyncpa [#allocation5], 1 }

</bundles_post_ra>
